<compile_context>
chip_gen: v7x
topology: tpu7x:2x2x1
jax: 0.10.0
libtpu: 0.0.40
codegen_flags: <defaults>
</compile_context>

<pallas_src>
import functools
import numpy as np

import jax
import jax.numpy as jnp
from jax import lax
from jax.experimental import pallas as pl
from jax.experimental.pallas import tpu as pltpu

EPS = 1e-12  # torch.nn.functional.normalize default eps


# ----------------------------------------------------------------------------
# Host-side fusion of the complex weights into real stacked matrices.
# ----------------------------------------------------------------------------
def _build_fused_weights(wq, wk, wv, wo, num_heads, hd2p):
    C, O = wq.shape
    hd = O // num_heads
    pad = hd2p - 2 * hd

    def ri(w):
        return jnp.real(w).astype(jnp.float32), jnp.imag(w).astype(jnp.float32)

    wqr, wqi = ri(wq)
    wkr, wki = ri(wk)
    wvr, wvi = ri(wv)
    wor, woi = ri(wo)

    def head_rows(wr, wi, swapped):
        # Channel-major projection rows for one stacked-real weight: per head,
        # [real-channel rows (hd); imag-channel rows (hd); zero pad rows (pad)].
        rows = []
        for n in range(num_heads):
            sl = slice(n * hd, (n + 1) * hd)
            r_rows = jnp.concatenate([wr[:, sl].T, -wi[:, sl].T], axis=1)   # (hd, 2C)
            i_rows = jnp.concatenate([wi[:, sl].T, wr[:, sl].T], axis=1)    # (hd, 2C)
            if swapped:                         # [k_i ; -k_r]
                rows += [i_rows, -r_rows]
            else:                               # [x_r ; x_i]
                rows += [r_rows, i_rows]
            if pad:
                rows.append(jnp.zeros((pad, 2 * C), jnp.float32))
        return jnp.concatenate(rows, axis=0)                                 # (R, 2C)

    # One fused projection matrix: rows = [Q block ; K block ; Kswap block ; V block].
    w_all = jnp.concatenate([head_rows(wqr, wqi, False),
                             head_rows(wkr, wki, False),
                             head_rows(wkr, wki, True),
                             head_rows(wvr, wvi, False)], axis=0)            # (4R, 2C)

    # Output projection (2O, R): columns in the attn-scratch row order
    # [out_r (hd) ; out_i (hd) ; pad] per head; rows = [final_real | final_imag].
    o_cols = []
    for n in range(num_heads):
        sl = slice(n * hd, (n + 1) * hd)
        o_cols.append(jnp.concatenate([wor[sl, :].T, woi[sl, :].T], axis=0))   # o_r cols
        o_cols.append(jnp.concatenate([-woi[sl, :].T, wor[sl, :].T], axis=0))  # o_i cols
        if pad:
            o_cols.append(jnp.zeros((2 * O, pad), jnp.float32))
    w_o = jnp.concatenate(o_cols, axis=1)                                    # (2O, R)
    return w_all, w_o


# ----------------------------------------------------------------------------
# Pallas kernel: fused projections + L2-normalize + causal complex MHA +
#                fused output projection, one batch element per grid step.
# ----------------------------------------------------------------------------
def _spectral_attn_kernel(fcm_ref, wall_ref, wo_ref, out_ref, attn_ref, *,
                          num_heads, hd2p, head_dim):
    R = num_heads * hd2p
    scale = 1.0 / head_dim

    f_cm = fcm_ref[0]                                  # (2C, HW) channel-major [fr ; fi]
    hw = f_cm.shape[1]

    # Iotas reused for both the causal mask and the MXU identity-transpose.
    rowi = lax.broadcasted_iota(jnp.int32, (hw, hw), 0)
    coli = lax.broadcasted_iota(jnp.int32, (hw, hw), 1)
    allowed = coli <= rowi
    eye = (coli == rowi).astype(jnp.float32)

    # ONE fused projection dot: (4R, 2C) @ (2C, HW) -> channel-major Q/K/Kswap/V.
    proj = jnp.dot(wall_ref[...], f_cm, preferred_element_type=jnp.float32)  # (4R, HW)
    q_cm = proj[0:R]                       # per-head rows [q_r ; q_i ; 0]
    k_cm = proj[R:2 * R]                   # per-head rows [k_r ; k_i ; 0]
    ks_cm = proj[2 * R:3 * R]              # per-head rows [k_i ; -k_r ; 0]
    v_cm = proj[3 * R:4 * R]               # per-head rows [v_r ; v_i ; 0]

    # F.normalize over the full complex channel dim (all heads jointly), matching
    # torch which normalizes BEFORE split_heads. Zero pad rows do not affect sums.
    inv_q = lax.rsqrt(jnp.maximum(jnp.sum(q_cm * q_cm, axis=0, keepdims=True), EPS * EPS))
    inv_k = lax.rsqrt(jnp.maximum(jnp.sum(k_cm * k_cm, axis=0, keepdims=True), EPS * EPS))
    inv_v = lax.rsqrt(jnp.maximum(jnp.sum(v_cm * v_cm, axis=0, keepdims=True), EPS * EPS))

    qn_cm = q_cm * (inv_q * scale)                      # fold 1/head_dim into q
    kn = (k_cm * inv_k).astype(jnp.bfloat16)
    ksn = (ks_cm * inv_k).astype(jnp.bfloat16)          # same per-column norm as k
    vn = (v_cm * inv_v).astype(jnp.bfloat16)

    # Position-major Q via an MXU identity matmul (NT dot): q_pm[x, r] = qn_cm[r, x].
    # Avoids shipping a second lane-sparse copy of the input from HBM and avoids an
    # XLU transpose of a non-128-multiple lane dim; the MXU has spare slots here.
    q_pm = lax.dot_general(eye, qn_cm, (((1,), (1,)), ((), ())),
                           preferred_element_type=jnp.float32)              # (HW, R)
    qn = q_pm.astype(jnp.bfloat16)

    nt = (((1,), (1,)), ((), ()))          # contract last dims: A @ B.T

    for n in range(num_heads):             # small static loop over heads
        lo = n * hd2p
        hi = lo + hd2p
        qh = qn[:, lo:hi]                  # (HW, hd2p) bf16  [q_r | q_i | 0]
        kh = kn[lo:hi]                     # (hd2p, HW) bf16  [k_r ; k_i ; 0]
        khs = ksn[lo:hi]                   # (hd2p, HW) bf16  [k_i ; -k_r ; 0]
        vh = vn[lo:hi]                     # (hd2p, HW) bf16  [v_r ; v_i ; 0]

        # s = conj(q) . k : real / imag each from one bf16 MXU dot, f32 accumulate.
        s_r = jnp.dot(qh, kh, preferred_element_type=jnp.float32)           # (HW, HW)
        s_i = jnp.dot(qh, khs, preferred_element_type=jnp.float32)
        s_abs = jnp.sqrt(s_r * s_r + s_i * s_i)

        # Causal softmax over allowed entries; no -inf fed through exp.
        m = jnp.max(jnp.where(allowed, s_abs, 0.0), axis=-1, keepdims=True)
        e = jnp.where(allowed, jnp.exp(s_abs - m), 0.0)
        l = jnp.sum(e, axis=-1, keepdims=True)
        p = (e * pl.reciprocal(l, approx=False)).astype(jnp.bfloat16)

        # out^T = v @ p^T -> (hd2p, HW) channel-major [out_r ; out_i ; 0], one NT dot,
        # stored to a sublane-tile-aligned scratch slab (hd2p is a multiple of 8).
        out_h = lax.dot_general(vh, p, nt, preferred_element_type=jnp.float32)
        attn_ref[lo:hi, :] = out_h

    # Fused complex output projection, lane-dense channel-major result (2O, HW).
    out_ref[0] = jnp.dot(wo_ref[...], attn_ref[...],
                         preferred_element_type=jnp.float32)


def spectral_attention_pallas(freqs, wq, wk, wv, wo, num_heads):
    """freqs: (B, C, HW) complex64. Returns (B, O, HW) complex64 (channel-major)."""
    B, C, HW = freqs.shape
    O = wq.shape[1]
    head_dim = O // num_heads
    hd2p = max(8, ((2 * head_dim + 7) // 8) * 8)       # per-head rows, sublane aligned
    R = num_heads * hd2p

    w_all, w_o = _build_fused_weights(wq, wk, wv, wo, num_heads, hd2p)

    fr = jnp.real(freqs).astype(jnp.float32)
    fi = jnp.imag(freqs).astype(jnp.float32)
    f_cm = jnp.concatenate([fr, fi], axis=1)            # (B, 2C, HW) channel-major

    kern = functools.partial(_spectral_attn_kernel, num_heads=num_heads,
                             hd2p=hd2p, head_dim=head_dim)

    flops = int(B * (2 * (4 * R) * (2 * C) * HW          # fused projection dot
                     + 2 * HW * HW * R                    # MXU identity transpose
                     + num_heads * 6 * HW * HW * hd2p     # scores + p@v
                     + 2 * (2 * O) * R * HW))             # output projection
    transcendentals = int(B * num_heads * 2 * HW * HW)    # exp + sqrt on scores
    bytes_accessed = int(4 * (B * 2 * C * HW + B * 2 * O * HW
                              + 4 * R * 2 * C + 2 * O * R))

    out = pl.pallas_call(
        kern,
        grid=(B,),
        in_specs=[
            pl.BlockSpec((1, 2 * C, HW), lambda b: (b, 0, 0)),
            pl.BlockSpec((4 * R, 2 * C), lambda b: (0, 0)),
            pl.BlockSpec((2 * O, R), lambda b: (0, 0)),
        ],
        out_specs=pl.BlockSpec((1, 2 * O, HW), lambda b: (b, 0, 0)),
        out_shape=jax.ShapeDtypeStruct((B, 2 * O, HW), jnp.float32),
        scratch_shapes=[pltpu.VMEM((R, HW), jnp.float32)],
        compiler_params=pltpu.CompilerParams(
            dimension_semantics=("parallel",),
            vmem_limit_bytes=48 * 1024 * 1024,
        ),
        cost_estimate=pl.CostEstimate(flops=flops,
                                      transcendentals=transcendentals,
                                      bytes_accessed=bytes_accessed),
    )(f_cm, w_all, w_o)

    # Output is channel-major: rows [0, O) real, [O, 2O) imag.
    return (out[:, :O, :] + 1j * out[:, O:, :]).astype(jnp.complex64)


# ----------------------------------------------------------------------------
# Plain-JAX glue (FFTs, positional encoding, anti-diagonal permutations)
# ----------------------------------------------------------------------------
def l2_normalize(x, axis, eps=EPS):
    n = jnp.sqrt(jnp.sum(jnp.abs(x) ** 2, axis=axis, keepdims=True))
    return x / jnp.maximum(n, eps)


def create_index_perm(height, width):
    # anti-diagonal traversal order used by custom_flatten / custom_unflatten
    perm = []
    for s in range(height + width - 1):
        for i in range(min(s + 1, height)):
            j = s - i
            if j < width:
                perm.append(i * width + j)
    return np.array(perm, dtype=np.int32)


def positional_encoding(b, h, w, lin_w, lin_b):
    xf = jnp.fft.fftfreq(h).astype(jnp.float32)        # (h,)
    yf = jnp.fft.rfftfreq(w).astype(jnp.float32)       # (w//2 + 1,)
    xg, yg = jnp.meshgrid(xf, yf, indexing="ij")       # (h, wft)
    grid = jnp.stack([xg, yg], axis=-1)                # (h, wft, 2)
    pe = grid @ lin_w.T + lin_b                        # (h, wft, d)
    pe = jnp.transpose(pe, (2, 0, 1))                  # (d, h, wft)
    pe = jnp.broadcast_to(pe[None], (b,) + pe.shape)   # (b, d, h, wft)
    pe = l2_normalize(pe, axis=1)
    return pe.astype(jnp.complex64)


def spectral_transformer_block(x, params, num_heads):
    # x: (B, C, H, W) float32   (NCHW, matching the PyTorch module)
    b, c, h, w = x.shape
    x = l2_normalize(x, axis=1)                                   # F.normalize(x)
    pe = positional_encoding(b, h, w, params["pe_w"], params["pe_b"])

    xfft = jnp.fft.rfft2(x, norm="ortho").astype(jnp.complex64)   # (B, C, H, Wft)
    hft, wft = xfft.shape[2], xfft.shape[3]
    hw = hft * wft
    xfft = xfft + pe

    perm = create_index_perm(hft, wft)
    inv_perm = np.argsort(perm)

    freqs = xfft.reshape(b, c, hw)[:, :, perm]                    # custom_flatten

    out = spectral_attention_pallas(freqs, params["wq"], params["wk"],
                                    params["wv"], params["wo"], num_heads)

    out = out[:, :, inv_perm].reshape(b, -1, hft, wft)            # custom_unflatten
    out = out + xfft                                              # residual
    y = jnp.fft.irfft2(out, norm="ortho")                         # (B, C, H, W) real
    # TODO(synk): nn.Dropout(0.1) treated as eval-mode identity (no RNG dropout).
    return y


# ----------------------------------------------------------------------------
if __name__ == "__main__":
    B, C, H, W = 2, 4, 16, 16
    num_heads = 2                 # out_channels (=C) must be divisible by heads
    O = C                         # residual add requires out_channels == in_channels

    key = jax.random.PRNGKey(0)
    keys = jax.random.split(key, 11)

    def crand(kr, ki, shape):
        return (jax.random.uniform(kr, shape, jnp.float32)
                + 1j * jax.random.uniform(ki, shape, jnp.float32)).astype(jnp.complex64)

    params = {
        "wq": crand(keys[0], keys[1], (C, O)),
        "wk": crand(keys[2], keys[3], (C, O)),
        "wv": crand(keys[4], keys[5], (C, O)),
        "wo": crand(keys[6], keys[7], (O, O)),
        "pe_w": jax.random.normal(keys[8], (O, 2), jnp.float32) * 0.1,
        "pe_b": jax.random.normal(keys[9], (O,), jnp.float32) * 0.1,
    }
    x = jax.random.normal(keys[10], (B, C, H, W), jnp.float32)

    y = spectral_transformer_block(x, params, num_heads)
    y = jax.block_until_ready(y)
    assert y.shape == (B, C, H, W) and y.dtype == jnp.float32
    assert bool(jnp.all(jnp.isfinite(y)))
    print("KERNEL_OK")
</pallas_src>

<mosaic_0001>
module attributes {stable_mosaic.version = 11 : i64} {
  func.func @_spectral_attn_kernel(%arg0: i32, %arg1: memref<1x8x144xf32, #tpu.memory_space<vmem>>, %arg2: memref<64x8xf32, #tpu.memory_space<vmem>>, %arg3: memref<8x16xf32, #tpu.memory_space<vmem>>, %arg4: memref<1x8x144xf32, #tpu.memory_space<vmem>>, %arg5: memref<16x144xf32, #tpu.memory_space<vmem>>) attributes {dimension_semantics = [#tpu.dimension_semantics<parallel>], iteration_bounds = array<i64: 2>, scalar_prefetch = 0 : i64, scratch_operands = 1 : i64, tpu.core_type = #tpu.core_type<tc>, window_params = [{transform_indices = @transform_0, window_bounds = array<i64: 1, 8, 144>}, {pipeline_mode = #tpu.pipeline_mode<synchronous>, transform_indices = @transform_1, window_bounds = array<i64: 64, 8>}, {pipeline_mode = #tpu.pipeline_mode<synchronous>, transform_indices = @transform_2, window_bounds = array<i64: 8, 16>}, {transform_indices = @transform_3, window_bounds = array<i64: 1, 8, 144>}]} {
    %c0 = arith.constant 0 : index
    %c0_0 = arith.constant 0 : index
    %c0_1 = arith.constant 0 : index
    %0 = vector.load %arg1[%c0, %c0_0, %c0_1] : memref<1x8x144xf32, #tpu.memory_space<vmem>>, vector<1x8x144xf32>
    %1 = vector.shape_cast %0 : vector<1x8x144xf32> to vector<8x144xf32>
    %2 = tpu.iota {dimensions = array<i32: 0>} : vector<144x144xi32>
    %3 = tpu.iota {dimensions = array<i32: 1>} : vector<144x144xi32>
    %4 = arith.cmpi sle, %3, %2 : vector<144x144xi32>
    %5 = arith.cmpi eq, %3, %2 : vector<144x144xi32>
    %6 = arith.extui %5 : vector<144x144xi1> to vector<144x144xi32>
    %7 = arith.sitofp %6 : vector<144x144xi32> to vector<144x144xf32>
    %c0_2 = arith.constant 0 : index
    %c0_3 = arith.constant 0 : index
    %8 = vector.load %arg2[%c0_2, %c0_3] : memref<64x8xf32, #tpu.memory_space<vmem>>, vector<64x8xf32>
    %cst = arith.constant dense<0.000000e+00> : vector<64x144xf32>
    %9 = tpu.matmul %8, %1, %cst {dimension_numbers = #tpu.dot_dimension_numbers<[1], [0], [0], [1], [0, 0, 1, 1], [], []>} : vector<64x8xf32>, vector<8x144xf32>, vector<64x144xf32> -> vector<64x144xf32>
    %10 = vector.extract_strided_slice %9 {offsets = [0, 0], sizes = [16, 144], strides = [1, 1]} : vector<64x144xf32> to vector<16x144xf32>
    %11 = vector.extract_strided_slice %9 {offsets = [16, 0], sizes = [16, 144], strides = [1, 1]} : vector<64x144xf32> to vector<16x144xf32>
    %12 = vector.extract_strided_slice %9 {offsets = [32, 0], sizes = [16, 144], strides = [1, 1]} : vector<64x144xf32> to vector<16x144xf32>
    %13 = vector.extract_strided_slice %9 {offsets = [48, 0], sizes = [16, 144], strides = [1, 1]} : vector<64x144xf32> to vector<16x144xf32>
    %14 = arith.mulf %10, %10 : vector<16x144xf32>
    %cst_4 = arith.constant dense<0.000000e+00> : vector<144xf32>
    %15 = vector.multi_reduction <add>, %14, %cst_4 [0] : vector<16x144xf32> to vector<144xf32>
    %16 = vector.shape_cast %15 : vector<144xf32> to vector<1x144xf32>
    %cst_5 = arith.constant 1.000000e-24 : f32
    %17 = vector.broadcast %cst_5 : f32 to vector<1x144xf32>
    %18 = arith.maximumf %16, %17 : vector<1x144xf32>
    %19 = math.rsqrt %18 : vector<1x144xf32>
    %20 = arith.mulf %11, %11 : vector<16x144xf32>
    %cst_6 = arith.constant dense<0.000000e+00> : vector<144xf32>
    %21 = vector.multi_reduction <add>, %20, %cst_6 [0] : vector<16x144xf32> to vector<144xf32>
    %22 = vector.shape_cast %21 : vector<144xf32> to vector<1x144xf32>
    %cst_7 = arith.constant 1.000000e-24 : f32
    %23 = vector.broadcast %cst_7 : f32 to vector<1x144xf32>
    %24 = arith.maximumf %22, %23 : vector<1x144xf32>
    %25 = math.rsqrt %24 : vector<1x144xf32>
    %26 = arith.mulf %13, %13 : vector<16x144xf32>
    %cst_8 = arith.constant dense<0.000000e+00> : vector<144xf32>
    %27 = vector.multi_reduction <add>, %26, %cst_8 [0] : vector<16x144xf32> to vector<144xf32>
    %28 = vector.shape_cast %27 : vector<144xf32> to vector<1x144xf32>
    %cst_9 = arith.constant 1.000000e-24 : f32
    %29 = vector.broadcast %cst_9 : f32 to vector<1x144xf32>
    %30 = arith.maximumf %28, %29 : vector<1x144xf32>
    %31 = math.rsqrt %30 : vector<1x144xf32>
    %cst_10 = arith.constant 5.000000e-01 : f32
    %32 = vector.broadcast %cst_10 : f32 to vector<1x144xf32>
    %33 = arith.mulf %19, %32 : vector<1x144xf32>
    %34 = vector.broadcast %33 : vector<1x144xf32> to vector<16x144xf32>
    %35 = arith.mulf %10, %34 : vector<16x144xf32>
    %36 = vector.broadcast %25 : vector<1x144xf32> to vector<16x144xf32>
    %37 = arith.mulf %11, %36 : vector<16x144xf32>
    %38 = arith.truncf %37 : vector<16x144xf32> to vector<16x144xbf16>
    %39 = vector.broadcast %25 : vector<1x144xf32> to vector<16x144xf32>
    %40 = arith.mulf %12, %39 : vector<16x144xf32>
    %41 = arith.truncf %40 : vector<16x144xf32> to vector<16x144xbf16>
    %42 = vector.broadcast %31 : vector<1x144xf32> to vector<16x144xf32>
    %43 = arith.mulf %13, %42 : vector<16x144xf32>
    %44 = arith.truncf %43 : vector<16x144xf32> to vector<16x144xbf16>
    %cst_11 = arith.constant dense<0.000000e+00> : vector<144x16xf32>
    %45 = tpu.matmul %7, %35, %cst_11 {dimension_numbers = #tpu.dot_dimension_numbers<[1], [1], [0], [0], [0, 0, 1, 0], [], []>} : vector<144x144xf32>, vector<16x144xf32>, vector<144x16xf32> -> vector<144x16xf32>
    %46 = arith.truncf %45 : vector<144x16xf32> to vector<144x16xbf16>
    %47 = vector.extract_strided_slice %46 {offsets = [0, 0], sizes = [144, 8], strides = [1, 1]} : vector<144x16xbf16> to vector<144x8xbf16>
    %48 = vector.extract_strided_slice %38 {offsets = [0, 0], sizes = [8, 144], strides = [1, 1]} : vector<16x144xbf16> to vector<8x144xbf16>
    %49 = vector.extract_strided_slice %41 {offsets = [0, 0], sizes = [8, 144], strides = [1, 1]} : vector<16x144xbf16> to vector<8x144xbf16>
    %50 = vector.extract_strided_slice %44 {offsets = [0, 0], sizes = [8, 144], strides = [1, 1]} : vector<16x144xbf16> to vector<8x144xbf16>
    %cst_12 = arith.constant dense<0.000000e+00> : vector<144x144xf32>
    %51 = tpu.matmul %47, %48, %cst_12 {dimension_numbers = #tpu.dot_dimension_numbers<[1], [0], [0], [1], [0, 0, 1, 1], [], []>} : vector<144x8xbf16>, vector<8x144xbf16>, vector<144x144xf32> -> vector<144x144xf32>
    %cst_13 = arith.constant dense<0.000000e+00> : vector<144x144xf32>
    %52 = tpu.matmul %47, %49, %cst_13 {dimension_numbers = #tpu.dot_dimension_numbers<[1], [0], [0], [1], [0, 0, 1, 1], [], []>} : vector<144x8xbf16>, vector<8x144xbf16>, vector<144x144xf32> -> vector<144x144xf32>
    %53 = arith.mulf %51, %51 : vector<144x144xf32>
    %54 = arith.mulf %52, %52 : vector<144x144xf32>
    %55 = arith.addf %53, %54 : vector<144x144xf32>
    %56 = math.sqrt %55 : vector<144x144xf32>
    %cst_14 = arith.constant 0.000000e+00 : f32
    %57 = vector.broadcast %cst_14 : f32 to vector<144x144xf32>
    %58 = arith.select %4, %56, %57 : vector<144x144xi1>, vector<144x144xf32>
    %cst_15 = arith.constant dense<0xFF800000> : vector<144xf32>
    %59 = vector.multi_reduction <maximumf>, %58, %cst_15 [1] : vector<144x144xf32> to vector<144xf32>
    %60 = vector.shape_cast %59 : vector<144xf32> to vector<144x1xf32>
    %61 = vector.broadcast %60 : vector<144x1xf32> to vector<144x144xf32>
    %62 = arith.subf %56, %61 : vector<144x144xf32>
    %63 = math.exp %62 : vector<144x144xf32>
    %cst_16 = arith.constant 0.000000e+00 : f32
    %64 = vector.broadcast %cst_16 : f32 to vector<144x144xf32>
    %65 = arith.select %4, %63, %64 : vector<144x144xi1>, vector<144x144xf32>
    %cst_17 = arith.constant dense<0.000000e+00> : vector<144xf32>
    %66 = vector.multi_reduction <add>, %65, %cst_17 [1] : vector<144x144xf32> to vector<144xf32>
    %67 = vector.shape_cast %66 : vector<144xf32> to vector<144x1xf32>
    %68 = tpu.reciprocal %67 : vector<144x1xf32> -> vector<144x1xf32>
    %69 = vector.broadcast %68 : vector<144x1xf32> to vector<144x144xf32>
    %70 = arith.mulf %65, %69 : vector<144x144xf32>
    %71 = arith.truncf %70 : vector<144x144xf32> to vector<144x144xbf16>
    %cst_18 = arith.constant dense<0.000000e+00> : vector<8x144xf32>
    %72 = tpu.matmul %50, %71, %cst_18 {dimension_numbers = #tpu.dot_dimension_numbers<[1], [1], [0], [0], [0, 0, 1, 0], [], []>} : vector<8x144xbf16>, vector<144x144xbf16>, vector<8x144xf32> -> vector<8x144xf32>
    %c0_19 = arith.constant 0 : index
    %c0_20 = arith.constant 0 : index
    %73 = vector.load %arg5[%c0_19, %c0_20] : memref<16x144xf32, #tpu.memory_space<vmem>>, vector<8x144xf32>
    tpu.vector_store %arg5[%c0_19, %c0_20], %72 {strides = array<i32>} : memref<16x144xf32, #tpu.memory_space<vmem>>, vector<8x144xf32>,
    %74 = vector.extract_strided_slice %46 {offsets = [0, 8], sizes = [144, 8], strides = [1, 1]} : vector<144x16xbf16> to vector<144x8xbf16>
    %75 = vector.extract_strided_slice %38 {offsets = [8, 0], sizes = [8, 144], strides = [1, 1]} : vector<16x144xbf16> to vector<8x144xbf16>
    %76 = vector.extract_strided_slice %41 {offsets = [8, 0], sizes = [8, 144], strides = [1, 1]} : vector<16x144xbf16> to vector<8x144xbf16>
    %77 = vector.extract_strided_slice %44 {offsets = [8, 0], sizes = [8, 144], strides = [1, 1]} : vector<16x144xbf16> to vector<8x144xbf16>
    %cst_21 = arith.constant dense<0.000000e+00> : vector<144x144xf32>
    %78 = tpu.matmul %74, %75, %cst_21 {dimension_numbers = #tpu.dot_dimension_numbers<[1], [0], [0], [1], [0, 0, 1, 1], [], []>} : vector<144x8xbf16>, vector<8x144xbf16>, vector<144x144xf32> -> vector<144x144xf32>
    %cst_22 = arith.constant dense<0.000000e+00> : vector<144x144xf32>
    %79 = tpu.matmul %74, %76, %cst_22 {dimension_numbers = #tpu.dot_dimension_numbers<[1], [0], [0], [1], [0, 0, 1, 1], [], []>} : vector<144x8xbf16>, vector<8x144xbf16>, vector<144x144xf32> -> vector<144x144xf32>
    %80 = arith.mulf %78, %78 : vector<144x144xf32>
    %81 = arith.mulf %79, %79 : vector<144x144xf32>
    %82 = arith.addf %80, %81 : vector<144x144xf32>
    %83 = math.sqrt %82 : vector<144x144xf32>
    %cst_23 = arith.constant 0.000000e+00 : f32
    %84 = vector.broadcast %cst_23 : f32 to vector<144x144xf32>
    %85 = arith.select %4, %83, %84 : vector<144x144xi1>, vector<144x144xf32>
    %cst_24 = arith.constant dense<0xFF800000> : vector<144xf32>
    %86 = vector.multi_reduction <maximumf>, %85, %cst_24 [1] : vector<144x144xf32> to vector<144xf32>
    %87 = vector.shape_cast %86 : vector<144xf32> to vector<144x1xf32>
    %88 = vector.broadcast %87 : vector<144x1xf32> to vector<144x144xf32>
    %89 = arith.subf %83, %88 : vector<144x144xf32>
    %90 = math.exp %89 : vector<144x144xf32>
    %cst_25 = arith.constant 0.000000e+00 : f32
    %91 = vector.broadcast %cst_25 : f32 to vector<144x144xf32>
    %92 = arith.select %4, %90, %91 : vector<144x144xi1>, vector<144x144xf32>
    %cst_26 = arith.constant dense<0.000000e+00> : vector<144xf32>
    %93 = vector.multi_reduction <add>, %92, %cst_26 [1] : vector<144x144xf32> to vector<144xf32>
    %94 = vector.shape_cast %93 : vector<144xf32> to vector<144x1xf32>
    %95 = tpu.reciprocal %94 : vector<144x1xf32> -> vector<144x1xf32>
    %96 = vector.broadcast %95 : vector<144x1xf32> to vector<144x144xf32>
    %97 = arith.mulf %92, %96 : vector<144x144xf32>
    %98 = arith.truncf %97 : vector<144x144xf32> to vector<144x144xbf16>
    %cst_27 = arith.constant dense<0.000000e+00> : vector<8x144xf32>
    %99 = tpu.matmul %77, %98, %cst_27 {dimension_numbers = #tpu.dot_dimension_numbers<[1], [1], [0], [0], [0, 0, 1, 0], [], []>} : vector<8x144xbf16>, vector<144x144xbf16>, vector<8x144xf32> -> vector<8x144xf32>
    %c8 = arith.constant 8 : index
    %c0_28 = arith.constant 0 : index
    %100 = vector.load %arg5[%c8, %c0_28] : memref<16x144xf32, #tpu.memory_space<vmem>>, vector<8x144xf32>
    tpu.vector_store %arg5[%c8, %c0_28], %99 {strides = array<i32>} : memref<16x144xf32, #tpu.memory_space<vmem>>, vector<8x144xf32>,
    %c0_29 = arith.constant 0 : index
    %c0_30 = arith.constant 0 : index
    %101 = vector.load %arg3[%c0_29, %c0_30] : memref<8x16xf32, #tpu.memory_space<vmem>>, vector<8x16xf32>
    %c0_31 = arith.constant 0 : index
    %c0_32 = arith.constant 0 : index
    %102 = vector.load %arg5[%c0_31, %c0_32] : memref<16x144xf32, #tpu.memory_space<vmem>>, vector<16x144xf32>
    %cst_33 = arith.constant dense<0.000000e+00> : vector<8x144xf32>
    %103 = tpu.matmul %101, %102, %cst_33 {dimension_numbers = #tpu.dot_dimension_numbers<[1], [0], [0], [1], [0, 0, 1, 1], [], []>} : vector<8x16xf32>, vector<16x144xf32>, vector<8x144xf32> -> vector<8x144xf32>
    %c0_34 = arith.constant 0 : index
    %c0_35 = arith.constant 0 : index
    %c0_36 = arith.constant 0 : index
    %104 = vector.load %arg4[%c0_34, %c0_35, %c0_36] : memref<1x8x144xf32, #tpu.memory_space<vmem>>, vector<1x8x144xf32>
    %105 = vector.shape_cast %104 : vector<1x8x144xf32> to vector<8x144xf32>
    %106 = vector.shape_cast %103 : vector<8x144xf32> to vector<1x8x144xf32>
    tpu.vector_store %arg4[%c0_34, %c0_35, %c0_36], %106 {strides = array<i32>} : memref<1x8x144xf32, #tpu.memory_space<vmem>>, vector<1x8x144xf32>,
    return
  }
  func.func @transform_0(%arg0: i32) -> (i32, i32, i32) {
    %c0_i32 = arith.constant 0 : i32
    %c0_i32_0 = arith.constant 0 : i32
    %c0_i32_1 = arith.constant 0 : i32
    return %arg0, %c0_i32, %c0_i32_0 : i32, i32, i32
  }
  func.func @transform_1(%arg0: i32) -> (i32, i32) {
    %c0_i32 = arith.constant 0 : i32
    %c0_i32_0 = arith.constant 0 : i32
    %c0_i32_1 = arith.constant 0 : i32
    return %c0_i32, %c0_i32_0 : i32, i32
  }
  func.func @transform_2(%arg0: i32) -> (i32, i32) {
    %c0_i32 = arith.constant 0 : i32
    %c0_i32_0 = arith.constant 0 : i32
    %c0_i32_1 = arith.constant 0 : i32
    return %c0_i32, %c0_i32_0 : i32, i32
  }
  func.func @transform_3(%arg0: i32) -> (i32, i32, i32) {
    %c0_i32 = arith.constant 0 : i32
    %c0_i32_0 = arith.constant 0 : i32
    %c0_i32_1 = arith.constant 0 : i32
    return %arg0, %c0_i32, %c0_i32_0 : i32, i32, i32
  }
}

</mosaic_0001>

<bundles_post_ra>
// kernel: tpu_custom_call.1
= control target key start
LH: loop header
LB: loop body
LE: loop exit
PB: predicated region body
PF: predicated region fallthrough
CT: control target
= control target key end

     0   :  { %8 = vsyncpa [#allocation4], 0  ;;  %s5168_s0 = inlined_call_operand.vmem [shape: f32[2,8,144], index: 0, kind: input, shape index: {}]   ;;  %s5169_s1 = inlined_call_operand.vmem [shape: f32[64,8], index: 1, kind: input, shape index: {}]   ;;  %s5170_s2 = inlined_call_operand.vmem [shape: f32[8,16], index: 2, kind: input, shape index: {}]   ;;  %s5171_s3 = inlined_call_operand.hbm [shape: f32[2,8,144], index: 3, kind: output, shape index: {}]  }
   0x1   :  { %10 = vsyncpa [#allocation4 + $0x1], 0  ;;  %s3739_s12 = smov 0   ;;  %s3741_s13 = smov 0  }
   0x2   :  { %s3743_s14 = smov 0   ;;  %s3745_s15 = smov 0  }
   0x3 LB: > { %s3760_s16 = sadd.s32 4294967295, %s3711_s15   ;;  %s3229_s17 = sadd.s32 4294967294, %s3711_s15   ;;  %s3711_s15 = sphi %s3745_s15, %s5266_s15   ;;  %s3707_s14 = sphi %s3743_s14, %s5265_s14   ;;  %s3703_s13 = sphi %s3741_s13, %s5264_s13   ;;  %s3699_s12 = sphi %s3739_s12, %s5263_s12  }
   0x4   : > { %s3764_s18 = sadd.s32 1, %s3711_s15   ;;  %s91_s19 = sadd.s32 1, %s3707_s14 }
   0x5   : > { %s88_s20 = ssub.s32 %s3711_s15, %s3764_s18  ;;  %p101_p0 = scmp.ne.s32.totalorder %s3707_s14, %s3703_s13 }
   0x6   : > { %p89_p1 = scmp.eq.s32.totalorder %s88_s20, 0  ;;  %p102_p2 = scmp.eq.s32.totalorder %s3760_s16, 1 }
   0x7   : > { %p107_p3 = scmp.ne.s32.totalorder %s3703_s13, %s3699_s12  ;;  %p108_p4 = scmp.eq.s32.totalorder %s3229_s17, 1 }
   0x8   : > { %s3775_s21 = scalar_select %p89_p1, %s3707_s14, %s91_s19  }
   0x9   : > { %p3777_p5 = por %p102_p2, %p101_p0  ;;  %p3781_p6 = por %p108_p4, %p107_p3 }
   0xa   : > { %p3232_p7 = scmp.ge.s32.totalorder %s3711_s15, 1  ;;  %p140_p8 = scmp.lt.s32.totalorder %s3711_s15, 3 }
   0xc   : > { %p141_p9 = pnand %p3232_p7, %p140_p8 }
   0xe   : > { %144 = sbr.rel (%p141_p9) target bundleno = 2228 (0x8b4), region = 32 }
  0x15   : > { %p164_p10 = scmp.lt.s32.totalorder %s3760_s16, 1  ;;  %v5172_v0 = vmov 0.0   ;;  %v338_v3 = vld [vmem:[%s5169_s1] sm:$0xff]  ;;  %vm5174_vm0 = vcmask 64512   ;;  %v339_v4 = vld [vmem:[%s5169_s1 + $0x8] sm:$0xff]  ;;  %v340_v5 = vld [vmem:[%s5169_s1 + $0x10] sm:$0xff] }
  0x16   : > { %435 = vmatprep.mubr.f32.mxu0 %v5172_v0  ;;  %720 = vmatprep.mubr.f32.mxu1 %v5172_v0  ;;  %v341_v6 = vld [vmem:[%s5169_s1 + $0x18] sm:$0xff]  ;;  %v342_v7 = vld [vmem:[%s5169_s1 + $0x20] sm:$0xff]  ;;  %v343_v8 = vld [vmem:[%s5169_s1 + $0x28] sm:$0xff]  ;;  %vm495_vm1 = vcmask 130048   ;;  %vm5173_vm3 = vcmask 1043456   ;;  %s3717_s27 = smov 120  }
  0x17   : > { %s165_s24 = scalar_select %p164_p10, %s3760_s16, 1  ;;  %v344_v9 = vld [vmem:[%s5169_s1 + $0x30] sm:$0xff]  ;;  %v345_v10 = vld [vmem:[%s5169_s1 + $0x38] sm:$0xff]  ;;  %vm3351_vm2 = vmpackc.low %vm495_vm1, %vm495_vm1 }
  0x18   : > { %s161_s30 = sand.u32 1, %s3703_s13   ;;  %s3349_s7 = sshll.u32 %s3760_s16, 8 }
  0x19   : > { %s3348_s25 = sshll.u32 %s165_s24, 4  ;;  %s3233_s4 = sshll.u32 %s161_s30, 4 }
  0x1a   : > { %s168_s28 = scalar_lea.vmem %s5168_s0, %s3348_s25  ;;  %s163_s5 = scalar_lea.vmem [#allocation3], %s3233_s4 }
  0x1b   : > { %v171_v1 = vld [vmem:[%s168_s28 + $0x8] sm:$0xff]  ;;  %v170_v2 = vld [vmem:[%s168_s28] sm:$0xff]  ;;  %s3170_s6 = sshll.u32 %s163_s5, 4  ;;  %s5127_s10 = scalar_lea.hbm %s5171_s3, %s3349_s7  ;;  %s5122_s6 = int_to_ptr.vmem [resolvable:$true] %s3170_s6 }
  0x1c   : > { %371 = vmatprep.subr.mxu0 %v171_v1  ;;  %s3156_s11 = scalar_lea.sflag [#allocation4], %s161_s30  ;;  %s3649_s17 = scalar_lea.vmem %s5122_s6, 256 }
  0x1d   : > { %372 = vmatpush1.msra.mxu0 %v170_v2  ;;  %p3650_p11 = scmp.ne.s32.totalorder %s5122_s6, %s3649_s17  ;;  %s3718_s16 = smov [#allocation3]  }
  0x1e   : > { %3254 = vmatmul.mubr.msk.f32.vlgmr.msra.gmra.mrb[0].mxu0 %vm5174_vm0, %v338_v3  ;;  %s3653_s19 = sshll.u32 %s3718_s16, 4  ;;  %s3654_s19 = int_to_ptr.vmem [resolvable:$false] %s3653_s19 }
  0x1f   : > { %441 = vmatprep.mubr.f32.mxu0 %v5172_v0  ;;  %p3651_p12 = pnand %p3650_p11, %p3777_p5  ;;  %s3655_s20 = scalar_lea.vmem %s3654_s19, 512 }
  0x20   : > { %p3656_p0 = scmp.lt.s32.totalorder %s5122_s6, %s3654_s19  ;;  %p3657_p1 = scmp.lt.s32.totalorder %s3655_s20, %s3649_s17 }
  0x21   : > { %p3652_p13 = pneg %p3651_p12 }
  0x22   : > { %3255 = vmatmul.mubr.msk.f32.gmra.mrb[2].mxu0 %vm5174_vm0, %v339_v4  ;;  %p3658_p2 = por %p3657_p1, %p3656_p0 }
  0x23   : > { %447 = vmatprep.mubr.f32.mxu0 %v5172_v0 }
  0x24   : > { %p3659_p3 = pnand %p3658_p2, %p3652_p13 }
  0x26   : > { %3256 = vmatmul.mubr.msk.f32.gmra.mrb[4].mxu0 %vm5174_vm0, %v340_v5 }
  0x27   : > { %453 = vmatprep.mubr.f32.mxu0 %v5172_v0 }
  0x2a   : > { %3257 = vmatmul.mubr.msk.f32.gmra.mrb[6].mxu0 %vm5174_vm0, %v341_v6 }
  0x2b   : > { %459 = vmatprep.mubr.f32.mxu0 %v5172_v0 }
  0x2e   : > { %3258 = vmatmul.mubr.msk.f32.gmra.mrb[8].mxu0 %vm5174_vm0, %v342_v7 }
  0x2f   : > { %465 = vmatprep.mubr.f32.mxu0 %v5172_v0 }
  0x32   : > { %3259 = vmatmul.mubr.msk.f32.gmra.mrb[10].mxu0 %vm5174_vm0, %v343_v8  ;;  %v172_v8 = vlaneseq }
  0x33   : > { %471 = vmatprep.mubr.f32.mxu0 %v5172_v0 }
  0x36   : > { %3260 = vmatmul.mubr.msk.f32.gmra.mrb[12].mxu0 %vm5174_vm0, %v344_v9 }
  0x37   : > { %477 = vmatprep.mubr.f32.mxu0 %v5172_v0 }
  0x3a   : > { %3261 = vmatmul.mubr.msk.f32.gmra.mrb[14].mxu0 %vm5174_vm0, %v345_v10 }
  0x3b   : > { %705 = vmatprep.mubr.f32.mxu0 %v5172_v0 }
  0xf1   : > { %v437_v11 = vpop.f32.mrb[0].mxu0 }
  0xf2   : > { %v3834_v12 = vpop.f32.mrb[1].mxu0  ;;  %v484_v15 = vmul.f32 %v437_v11, %v437_v11 }
  0xf3   : > { %v485_v13 = vmul.f32 %v3834_v12, %v3834_v12 }
  0xf5   : > { %v443_v14 = vpop.f32.mrb[2].mxu0  ;;  %v496_v20 = vsel %vm495_vm1, %v485_v13, 0.0 }
  0xf6   : > { %v486_v16 = vmul.f32 %v443_v14, %v443_v14  ;;  %v445_v17 = vpop.f32.mrb[3].mxu0 }
  0xf7   : > { %v487_v18 = vmul.f32 %v445_v17, %v445_v17 }
  0xf8   : > { %v488_v19 = vadd.f32 %v486_v16, %v484_v15 }
  0xf9   : > { %v497_v21 = vsel %vm495_vm1, %v487_v18, 0.0  ;;  %v3840_v22 = vpop.f32.mrb[4].mxu0  ;;  %v3855_v18 = vshrl.u32 %v172_v8, 7 }
  0xfa   : > { %v489_v23 = vrot.slane %v488_v19, 4  ;;  %v498_v24 = vadd.f32 %v497_v21, %v496_v20  ;;  %v3842_v25 = vpop.f32.mrb[5].mxu0  ;;  %v509_v29 = vmul.f32 %v3840_v22, %v3840_v22 }
  0xfb   : > { %v510_v26 = vmul.f32 %v3842_v25, %v3842_v25  ;;  %v3868_v20 = vadd.s32 24, %v3855_v18 }
  0xfc   : > { %v490_v27 = vadd.f32 %v489_v23, %v488_v19  ;;  %v499_v28 = vrot.slane %v498_v24, 4 }
  0xfd   : > { %v455_v30 = vpop.f32.mrb[6].mxu0  ;;  %v520_v35 = vsel %vm495_vm1, %v510_v26, 0.0 }
  0xfe   : > { %v491_v31 = vrot.slane %v490_v27, 2  ;;  %v500_v32 = vadd.f32 %v499_v28, %v498_v24  ;;  %v511_v33 = vmul.f32 %v455_v30, %v455_v30  ;;  %v457_v34 = vpop.f32.mrb[7].mxu0  ;;  %v3888_v28 = vadd.s32 32, %v3855_v18 }
  0xff   : > { %v512_v36 = vmul.f32 %v457_v34, %v457_v34 }
 0x100   : > { %v492_v37 = vadd.f32 %v491_v31, %v490_v27  ;;  %v501_v38 = vrot.slane %v500_v32, 2  ;;  %v513_v39 = vadd.f32 %v511_v33, %v509_v29  ;;  %v3883_v27 = vadd.s32 8, %v3855_v18 }
 0x101   : > { %v521_v40 = vsel %vm495_vm1, %v512_v36, 0.0  ;;  %v461_v41 = vpop.f32.mrb[8].mxu0  ;;  %v3714_v29 = vmov 1.0   ;;  %v3906_v31 = vadd.s32 40, %v3855_v18  ;;  %v3925_v33 = vadd.s32 56, %v3855_v18 }
 0x102   : > { %v493_v42 = vrot.slane %v492_v37, 1  ;;  %v502_v43 = vadd.f32 %v501_v38, %v500_v32  ;;  %v514_v44 = vrot.slane %v513_v39, 4  ;;  %v522_v45 = vadd.f32 %v521_v40, %v520_v35  ;;  %v463_v46 = vpop.f32.mrb[9].mxu0 }
 0x103   : > { %v3917_v32 = vadd.s32 48, %v3855_v18  ;;  %v3939_v35 = vadd.s32 72, %v3855_v18  ;;  %v3946_v36 = vadd.s32 80, %v3855_v18  ;;  %v3960_v38 = vadd.s32 96, %v3855_v18 }
 0x104   : > { %v494_v47 = vadd.f32 %v493_v42, %v492_v37  ;;  %v503_v48 = vrot.slane %v502_v43, 1  ;;  %v515_v49 = vadd.f32 %v514_v44, %v513_v39  ;;  %v523_v50 = vrot.slane %v522_v45, 4 }
 0x105   : > { %v3953_v37 = vadd.s32 88, %v3855_v18  ;;  %v3967_v39 = vadd.s32 104, %v3855_v18  ;;  %v467_v40 = vpop.f32.mrb[10].mxu0 }
 0x106   : > { %v505_v51 = vmax.f32 %v494_v47, 1e-24  ;;  %v504_v52 = vadd.f32 %v503_v48, %v502_v43  ;;  %v516_v53 = vrot.slane %v515_v49, 2  ;;  %v524_v54 = vadd.f32 %v523_v50, %v522_v45  ;;  %v469_v43 = vpop.f32.mrb[11].mxu0 }
 0x107   : > { %v3979_v45 = vadd.s32 128, %v3855_v18  ;;  %v3993_v50 = vadd.s32 120, %v3855_v18 }
 0x108   : > { %3405 = vrsqrt.f32 %v505_v51  ;;  %v506_v55 = vmax.f32 %v504_v52, 1e-24  ;;  %v517_v56 = vadd.f32 %v516_v53, %v515_v49  ;;  %v525_v57 = vrot.slane %v524_v54, 2 }
 0x109   : > { %v473_v49 = vpop.f32.mrb[12].mxu0 }
 0x10a   : > { %3407 = vrsqrt.f32 %v506_v55  ;;  %v518_v58 = vrot.slane %v517_v56, 1  ;;  %v526_v59 = vadd.f32 %v525_v57, %v524_v54  ;;  %v475_v52 = vpop.f32.mrb[13].mxu0  ;;  %v4001_v55 = vadd.s32 136, %v3855_v18 }
 0x10b   : > { %v534_v54 = vmul.f32 %v475_v52, %v475_v52 }
 0x10c   : > { %v519_v60 = vadd.f32 %v518_v58, %v517_v56  ;;  %v527_v61 = vrot.slane %v526_v59, 1  ;;  %v533_v56 = vmul.f32 %v473_v49, %v473_v49 }
 0x10d   : > { %v479_v57 = vpop.f32.mrb[14].mxu0 }
 0x10e   : > { %v529_v62 = vmax.f32 %v519_v60, 1e-24  ;;  %v528_v63 = vadd.f32 %v527_v61, %v526_v59  ;;  %v535_v58 = vmul.f32 %v479_v57, %v479_v57  ;;  %v481_v59 = vpop.f32.mrb[15].mxu0  ;;  %v544_v61 = vsel %vm495_vm1, %v534_v54, 0.0 }
 0x110   : > { %3409 = vrsqrt.f32 %v529_v62  ;;  %v530_v1 = vmax.f32 %v528_v63, 1e-24  ;;  %v536_v62 = vmul.f32 %v481_v59, %v481_v59  ;;  %v537_v63 = vadd.f32 %v535_v58, %v533_v56 }
 0x112   : > { %v3406_v2 = vpop.eup %3405  ;;  %3411 = vrsqrt.f32 %v530_v1  ;;  %v545_v1 = vsel %vm495_vm1, %v536_v62, 0.0 }
 0x113   : > { %v557_v3 = vmul.f32 0.5, %v3406_v2  ;;  %v538_v2 = vrot.slane %v537_v63, 4 }
 0x114   : > { %v3408_v4 = vpop.eup %3407 }
 0x115   : > { %v559_v5 = vmul.f32 %v557_v3, %v437_v11  ;;  %v561_v6 = vmul.f32 %v557_v3, %v443_v14  ;;  %v558_v7 = vmul.f32 0.5, %v3408_v4  ;;  %v546_v3 = vadd.f32 %v545_v1, %v544_v61 }
 0x117   : > { %v3353_v9 = vpack.c.bf16 %v561_v6, %v559_v5  ;;  %v560_v10 = vmul.f32 %v558_v7, %v3834_v12  ;;  %v562_v13 = vmul.f32 %v558_v7, %v445_v17  ;;  %v3865_v17 = vand.u32 127, %v172_v8 }
 0x118   : > { %v539_v5 = vadd.f32 %v538_v2, %v537_v63  ;;  %v547_v6 = vrot.slane %v546_v3, 4 }
 0x119   : > { %v3350_v15 = vpack.c.bf16 %v562_v13, %v560_v10  ;;  %vm230_vm4 = vcmp.eq.s32.totalorder %v3865_v17, %v3855_v18  ;;  %vm236_vm5 = vcmp.eq.s32.totalorder %v3865_v17, %v3868_v20  ;;  %vm232_vm6 = vcmp.eq.s32.totalorder %v3865_v17, %v3883_v27 }
 0x11a   : > { %v3853_v16 = vpop.eup %3409  ;;  %vm238_vm7 = vcmp.eq.s32.totalorder %v3865_v17, %v3888_v28  ;;  %vm240_vm9 = vcmp.eq.s32.totalorder %v3865_v17, %v3906_v31  ;;  %vm242_vm10 = vcmp.eq.s32.totalorder %v3865_v17, %v3917_v32  ;;  %vm244_vm11 = vcmp.eq.s32.totalorder %v3865_v17, %v3925_v33 }
 0x11b   : > { %3352 = vmatprep.subr.msk.bf16.mxu0 %vm3351_vm2, %v3350_v15  ;;  %3359 = vmatprep.subr.msk.bf16.mxu1 %vm3351_vm2, %v3350_v15  ;;  %v563_v11 = vmul.f32 %v3853_v16, %v3840_v22  ;;  %v565_v14 = vmul.f32 %v3853_v16, %v455_v30  ;;  %v3861_v19 = vmul.f32 %v3853_v16, %v461_v41  ;;  %v3900_v30 = vadd.s32 16, %v3855_v18 }
 0x11c   : > { %v3863_v12 = vpop.eup %3411  ;;  %3354 = vmatpush1.bf16.xpose.msra.mxu0 %v3353_v9  ;;  %3360 = vmatpush1.bf16.xpose.msra.mxu1 %v3353_v9  ;;  %vm248_vm13 = vcmp.eq.s32.totalorder %v3865_v17, %v3939_v35  ;;  %vm250_vm14 = vcmp.eq.s32.totalorder %v3865_v17, %v3946_v36  ;;  %vm252_vm15 = vcmp.eq.s32.totalorder %v3865_v17, %v3953_v37  ;;  %v3974_v41 = vadd.s32 112, %v3855_v18 }
 0x11d   : > { %v3870_v21 = vpack.c.bf16 %v565_v14, %v563_v11  ;;  %v564_v23 = vmul.f32 %v3863_v12, %v3842_v25  ;;  %v566_v22 = vmul.f32 %v3863_v12, %v457_v34  ;;  %v3876_v24 = vmul.f32 %v3863_v12, %v463_v46 }
 0x11e   : > { %vm234_vm8 = vcmp.eq.s32.totalorder %v3865_v17, %v3900_v30  ;;  %v3932_v34 = vadd.s32 64, %v3855_v18  ;;  %vm254_vm2 = vcmp.eq.s32.totalorder %v3865_v17, %v3960_v38  ;;  %v571_v42 = vmul.f32 %v3853_v16, %v467_v40 }
 0x11f   : > { %5197 = vst [vmem:[#allocation6_spill] sm:$0xff] %v3870_v21  ;;  %v3878_v26 = vpack.c.bf16 %v566_v22, %v564_v23  ;;  %v834_v25 = vsel %vm5173_vm3, %v3870_v21, 0  ;;  %v572_v44 = vmul.f32 %v3863_v12, %v469_v43  ;;  %v3982_v46 = vadd.s32 128, %v3865_v17 }
 0x120   : > { %vm246_vm12 = vcmp.eq.s32.totalorder %v3865_v17, %v3932_v34  ;;  %v3985_v47 = vpack.c.bf16 %v571_v42, %v3861_v19  ;;  %v540_v7 = vrot.slane %v539_v5, 2  ;;  %v548_v8 = vadd.f32 %v547_v6, %v546_v3 }
 0x121   : > { %5198 = vst [vmem:[#allocation7_spill] sm:$0xff] %v3878_v26  ;;  %3282 = vmatprep.subr.msk.bf16.mxu0 %vm5173_vm3, %v3878_v26  ;;  %v574_v48 = vpack.c.bf16 %v572_v44, %v3876_v24  ;;  %v5175_v44 = vmov 0  }
 0x122   : > { %v963_v51 = vsel %vm5173_vm3, %v3985_v47, 0  ;;  %v541_v9 = vadd.f32 %v540_v7, %v539_v5  ;;  %v549_v10 = vrot.slane %v548_v8, 2  ;;  %v2109_v56 = vrot.slane %v3985_v47, 4 }
 0x123   : > { %3264 = vmatmul.mubr.msk.f32.vlgmr.msra.gmra.mrb[16].mxu0 %vm230_vm4, %v3714_v29  ;;  %3267 = vmatmul.mubr.msk.f32.vlgmr.msra.gmra.mrb[0].mxu1 %vm236_vm5, %v3714_v29  ;;  %vm256_vm4 = vcmp.eq.s32.totalorder %v3865_v17, %v3967_v39  ;;  %vm258_vm5 = vcmp.eq.s32.totalorder %v3865_v17, %v3974_v41  ;;  %v2110_v53 = vrot.slane %v574_v48, 4 }
 0x124   : > { %710 = vmatprep.mubr.f32.mxu0 %v5172_v0  ;;  %725 = vmatprep.mubr.f32.mxu1 %v5172_v0  ;;  %v542_v13 = vrot.slane %v541_v9, 1  ;;  %v550_v15 = vadd.f32 %v549_v10, %v548_v8 }
 0x125   : > { %840 = vmatpush1.bf16.msra.mxu0 %v834_v25  ;;  %3292 = vmatprep.subr.msk.bf16.mxu1 %vm5173_vm3, %v574_v48 }
 0x126   : > { %969 = vmatpush1.bf16.msra.mxu1 %v963_v51  ;;  %v543_v16 = vadd.f32 %v542_v13, %v541_v9  ;;  %v551_v11 = vrot.slane %v550_v15, 1 }
 0x127   : > { %3265 = vmatmul.mubr.msk.f32.gmra.mrb[18].mxu0 %vm232_vm6, %v3714_v29  ;;  %3268 = vmatmul.mubr.msk.f32.gmra.mrb[2].mxu1 %vm238_vm7, %v3714_v29  ;;  %vm263_vm6 = vcmp.eq.s32.totalorder %v3982_v46, %v3979_v45  ;;  %vm260_vm7 = vcmp.eq.s32.totalorder %v3865_v17, %v3993_v50 }
 0x128   : > { %715 = vmatprep.mubr.f32.mxu0 %v5172_v0  ;;  %730 = vmatprep.mubr.f32.mxu1 %v5172_v0  ;;  %v3252_v60 = vsel %vm263_vm6, 1.0, %v5172_v0  ;;  %v553_v14 = vmax.f32 %v543_v16, 1e-24  ;;  %v552_v19 = vadd.f32 %v551_v11, %v550_v15 }
 0x129   : > { %3322 = vmatprep.subr.msk.bf16.mxu1 %vm5173_vm3, %v2110_v53 }
 0x12a   : > { %3413 = vrsqrt.f32 %v553_v14  ;;  %v554_v12 = vmax.f32 %v552_v19, 1e-24 }
 0x12b   : > { %3266 = vmatmul.mubr.msk.f32.gmra.mrb[20].mxu0 %vm234_vm8, %v3714_v29  ;;  %3269 = vmatmul.mubr.msk.f32.gmra.mrb[4].mxu1 %vm240_vm9, %v3714_v29  ;;  %vm265_vm8 = vcmp.eq.s32.totalorder %v3982_v46, %v4001_v55  ;;  %vm194_vm9 = vcmp.le.s32.totalorder %v3865_v17, %v3855_v18 }
 0x12c   : > { %735 = vmatprep.mubr.f32.mxu1 %v5172_v0  ;;  %v3253_v4 = vsel %vm265_vm8, 1.0, %v5172_v0  ;;  %3415 = vrsqrt.f32 %v554_v12  ;;  %871 = vmatprep.mubr.bf16.mxu0 %v5175_v44  ;;  %vm202_vm8 = vcmp.le.s32.totalorder %v3865_v17, %v3888_v28 }
 0x12f   : > { %3270 = vmatmul.mubr.msk.f32.gmra.mrb[6].mxu1 %vm242_vm10, %v3714_v29 }
 0x130   : > { %740 = vmatprep.mubr.f32.mxu1 %v5172_v0 }
 0x133   : > { %3271 = vmatmul.mubr.msk.f32.gmra.mrb[8].mxu1 %vm244_vm11, %v3714_v29  ;;  %vm196_vm11 = vcmp.le.s32.totalorder %v3865_v17, %v3883_v27 }
 0x134   : > { %745 = vmatprep.mubr.f32.mxu1 %v5172_v0  ;;  %v3414_v23 = vpop.eup %3413 }
 0x135   : > { %v575_v22 = vmul.f32 %v3414_v23, %v473_v49  ;;  %v577_v24 = vmul.f32 %v3414_v23, %v479_v57 }
 0x136   : > { %v3416_v25 = vpop.eup %3415 }
 0x137   : > { %3272 = vmatmul.mubr.msk.f32.gmra.mrb[10].mxu1 %vm246_vm12, %v3714_v29  ;;  %v576_v40 = vmul.f32 %v3416_v25, %v475_v52  ;;  %v578_v42 = vmul.f32 %v3416_v25, %v481_v59  ;;  %v2112_v59 = vsel %vm5173_vm3, %v2109_v56, 0 }
 0x138   : > { %750 = vmatprep.mubr.f32.mxu1 %v5172_v0 }
 0x139   : > { %v4021_v43 = vpack.c.bf16 %v578_v42, %v576_v40 }
 0x13b   : > { %3273 = vmatmul.mubr.msk.f32.gmra.mrb[12].mxu1 %vm248_vm13, %v3714_v29  ;;  %5200 = vst [vmem:[#allocation9_spill] sm:$0xff] %v4021_v43 }
 0x13c   : > { %755 = vmatprep.mubr.f32.mxu1 %v5172_v0 }
 0x13f   : > { %3274 = vmatmul.mubr.msk.f32.gmra.mrb[14].mxu1 %vm250_vm14, %v3714_v29 }
 0x140   : > { %760 = vmatprep.mubr.f32.mxu1 %v5172_v0 }
 0x143   : > { %3275 = vmatmul.mubr.msk.f32.gmra.mrb[16].mxu1 %vm252_vm15, %v3714_v29  ;;  %vm198_vm15 = vcmp.le.s32.totalorder %v3865_v17, %v3900_v30 }
 0x144   : > { %765 = vmatprep.mubr.f32.mxu1 %v5172_v0 }
 0x147   : > { %3276 = vmatmul.mubr.msk.f32.gmra.mrb[18].mxu1 %vm254_vm2, %v3714_v29 }
 0x148   : > { %770 = vmatprep.mubr.f32.mxu1 %v5172_v0 }
 0x14b   : > { %3277 = vmatmul.mubr.msk.f32.gmra.mrb[20].mxu1 %vm256_vm4, %v3714_v29 }
 0x14c   : > { %775 = vmatprep.mubr.f32.mxu1 %v5172_v0 }
 0x14f   : > { %3278 = vmatmul.mubr.msk.f32.gmra.mrb[22].mxu1 %vm258_vm5, %v3714_v29  ;;  %vm200_vm5 = vcmp.le.s32.totalorder %v3865_v17, %v3868_v20 }
 0x150   : > { %780 = vmatprep.mubr.f32.mxu1 %v5172_v0 }
 0x153   : > { %3279 = vmatmul.mubr.msk.f32.gmra.mrb[24].mxu1 %vm260_vm7, %v3714_v29  ;;  %v4019_v29 = vpack.c.bf16 %v577_v24, %v575_v22 }
 0x154   : > { %3280 = vmatprep.mubr.msk.f32.mxu1 %vm495_vm1, %v3252_v60 }
 0x155   : > { %5199 = vst [vmem:[#allocation8_spill] sm:$0xff] %v4019_v29 }
 0x157   : > { %786 = vmatmul.mubr.f32.gmra.mrb[26].mxu1 %v5172_v0 }
 0x158   : > { %3281 = vmatprep.mubr.msk.f32.mxu1 %vm495_vm1, %v3253_v4 }
 0x15b   : > { %791 = vmatmul.mubr.f32.gmra.mrb[28].mxu1 %v5172_v0 }
 0x15c   : > { %1000 = vmatprep.mubr.bf16.mxu1 %v5175_v44 }
 0x1f6   : > { %v707_v48 = vpop.f32.mrb[16].mxu0  ;;  %v722_v51 = vpop.f32.mrb[0].mxu1 }
 0x1f7   : > { %v709_v53 = vpop.f32.mrb[17].mxu0  ;;  %v724_v54 = vpop.f32.mrb[1].mxu1 }
 0x1fa   : > { %v712_v49 = vpop.f32.mrb[18].mxu0  ;;  %v727_v57 = vpop.f32.mrb[2].mxu1 }
 0x1fb   : > { %v4026_v58 = vpack.c.bf16 %v712_v49, %v707_v48  ;;  %v714_v60 = vpop.f32.mrb[19].mxu0  ;;  %v729_v52 = vpop.f32.mrb[3].mxu1 }
 0x1fd   : > { %3283 = vmatmul.mubr.msk.bf16.vlgmr.msra.gmra.mrb[24].mxu0 %vm5174_vm0, %v4026_v58  ;;  %3293 = vmatmul.mubr.msk.bf16.vlgmr.msra.gmra.mrb[32].mxu1 %vm5174_vm0, %v4026_v58 }
 0x1fe   : > { %2118 = vmatpush1.bf16.msra.mxu1 %v2112_v59  ;;  %v717_v61 = vpop.f32.mrb[20].mxu0  ;;  %881 = vmatprep.mubr.bf16.mxu0 %v5175_v44  ;;  %v732_v62 = vpop.f32.mrb[4].mxu1 }
 0x1ff   : > { %v4034_v47 = vpack.c.bf16 %v722_v51, %v717_v61  ;;  %1010 = vmatprep.mubr.bf16.mxu1 %v5175_v44  ;;  %v4037_v63 = vpack.c.bf16 %v732_v62, %v727_v57  ;;  %v734_v1 = vpop.f32.mrb[5].mxu1  ;;  %v719_v2 = vpop.f32.mrb[21].mxu0 }
 0x202   : > { %v737_v3 = vpop.f32.mrb[6].mxu1 }
 0x203   : > { %v739_v4 = vpop.f32.mrb[7].mxu1 }
 0x205   : > { %3284 = vmatmul.mubr.msk.bf16.gmra.mrb[28].mxu0 %vm5174_vm0, %v4034_v47  ;;  %3294 = vmatmul.mubr.msk.bf16.gmra.mrb[36].mxu1 %vm5174_vm0, %v4034_v47 }
 0x206   : > { %891 = vmatprep.mubr.bf16.mxu0 %v5175_v44  ;;  %1020 = vmatprep.mubr.bf16.mxu1 %v5175_v44  ;;  %v742_v5 = vpop.f32.mrb[8].mxu1 }
 0x207   : > { %v4045_v6 = vpack.c.bf16 %v742_v5, %v737_v3  ;;  %v744_v7 = vpop.f32.mrb[9].mxu1 }
 0x20a   : > { %v747_v8 = vpop.f32.mrb[10].mxu1 }
 0x20b   : > { %v749_v9 = vpop.f32.mrb[11].mxu1 }
 0x20d   : > { %3285 = vmatmul.mubr.msk.bf16.gmra.mrb[32].mxu0 %vm5174_vm0, %v4037_v63  ;;  %3295 = vmatmul.mubr.msk.bf16.gmra.mrb[40].mxu1 %vm5174_vm0, %v4037_v63 }
 0x20e   : > { %901 = vmatprep.mubr.bf16.mxu0 %v5175_v44  ;;  %1030 = vmatprep.mubr.bf16.mxu1 %v5175_v44  ;;  %v752_v10 = vpop.f32.mrb[12].mxu1 }
 0x20f   : > { %v4053_v13 = vpack.c.bf16 %v752_v10, %v747_v8  ;;  %v754_v15 = vpop.f32.mrb[13].mxu1 }
 0x212   : > { %v757_v16 = vpop.f32.mrb[14].mxu1 }
 0x213   : > { %v759_v11 = vpop.f32.mrb[15].mxu1 }
 0x215   : > { %3286 = vmatmul.mubr.msk.bf16.gmra.mrb[36].mxu0 %vm5174_vm0, %v4045_v6  ;;  %3296 = vmatmul.mubr.msk.bf16.gmra.mrb[44].mxu1 %vm5174_vm0, %v4045_v6 }
 0x216   : > { %911 = vmatprep.mubr.bf16.mxu0 %v5175_v44  ;;  %1040 = vmatprep.mubr.bf16.mxu1 %v5175_v44  ;;  %v762_v14 = vpop.f32.mrb[16].mxu1 }
 0x217   : > { %v4061_v19 = vpack.c.bf16 %v762_v14, %v757_v16  ;;  %v764_v12 = vpop.f32.mrb[17].mxu1 }
 0x219   : > { %5201 = vst [vmem:[#allocation10_spill] sm:$0xff] %v4061_v19 }
 0x21a   : > { %v767_v23 = vpop.f32.mrb[18].mxu1 }
 0x21b   : > { %v769_v22 = vpop.f32.mrb[19].mxu1 }
 0x21d   : > { %3287 = vmatmul.mubr.msk.bf16.gmra.mrb[40].mxu0 %vm5174_vm0, %v4053_v13  ;;  %3297 = vmatmul.mubr.msk.bf16.gmra.mrb[48].mxu1 %vm5174_vm0, %v4053_v13 }
 0x21e   : > { %921 = vmatprep.mubr.bf16.mxu0 %v5175_v44  ;;  %1050 = vmatprep.mubr.bf16.mxu1 %v5175_v44  ;;  %v772_v24 = vpop.f32.mrb[20].mxu1 }
 0x21f   : > { %v4069_v25 = vpack.c.bf16 %v772_v24, %v767_v23  ;;  %v774_v40 = vpop.f32.mrb[21].mxu1 }
 0x221   : > { %5202 = vst [vmem:[#allocation11_spill] sm:$0xff] %v4069_v25 }
 0x222   : > { %v777_v42 = vpop.f32.mrb[22].mxu1 }
 0x223   : > { %v779_v48 = vpop.f32.mrb[23].mxu1 }
 0x225   : > { %3288 = vmatmul.mubr.msk.bf16.gmra.mrb[44].mxu0 %vm5174_vm0, %v4061_v19  ;;  %3298 = vmatmul.mubr.msk.bf16.gmra.mrb[52].mxu1 %vm5174_vm0, %v4061_v19 }
 0x226   : > { %931 = vmatprep.mubr.bf16.mxu0 %v5175_v44  ;;  %1060 = vmatprep.mubr.bf16.mxu1 %v5175_v44  ;;  %v782_v51 = vpop.f32.mrb[24].mxu1 }
 0x227   : > { %v4077_v53 = vpack.c.bf16 %v782_v51, %v777_v42  ;;  %v784_v54 = vpop.f32.mrb[25].mxu1 }
 0x229   : > { %5203 = vst [vmem:[#allocation12_spill] sm:$0xff] %v4077_v53 }
 0x22a   : > { %v787_v56 = vpop.f32.mrb[26].mxu1 }
 0x22b   : > { %v789_v49 = vpop.f32.mrb[27].mxu1 }
 0x22d   : > { %3289 = vmatmul.mubr.msk.bf16.gmra.mrb[48].mxu0 %vm5174_vm0, %v4069_v25  ;;  %3299 = vmatmul.mubr.msk.bf16.gmra.mrb[56].mxu1 %vm5174_vm0, %v4069_v25 }
 0x22e   : > { %941 = vmatprep.mubr.bf16.mxu0 %v5175_v44  ;;  %1070 = vmatprep.mubr.bf16.mxu1 %v5175_v44  ;;  %v792_v57 = vpop.f32.mrb[28].mxu1 }
 0x22f   : > { %v4085_v60 = vpack.c.bf16 %v792_v57, %v787_v56  ;;  %v794_v52 = vpop.f32.mrb[29].mxu1 }
 0x231   : > { %5204 = vst [vmem:[#allocation13_spill] sm:$0xff] %v4085_v60 }
 0x235   : > { %3290 = vmatmul.mubr.msk.bf16.gmra.mrb[52].mxu0 %vm5174_vm0, %v4077_v53  ;;  %3300 = vmatmul.mubr.msk.bf16.gmra.mrb[60].mxu1 %vm5174_vm0, %v4077_v53 }
 0x236   : > { %951 = vmatprep.mubr.bf16.mxu0 %v5175_v44  ;;  %1080 = vmatprep.mubr.bf16.mxu1 %v5175_v44 }
 0x23d   : > { %3291 = vmatmul.mubr.msk.bf16.gmra.mrb[56].mxu0 %vm5174_vm0, %v4085_v60  ;;  %3301 = vmatmul.mubr.msk.bf16.gmra.mrb[64].mxu1 %vm5174_vm0, %v4085_v60 }
 0x23e   : > { %3311 = vmatprep.mubr.msk.bf16.mxu0 %vm495_vm1, %v4021_v43  ;;  %2149 = vmatprep.mubr.bf16.mxu1 %v5175_v44 }
 0x2d0   : > { %v873_v59 = vpop.f32.mrb[24].mxu0  ;;  %v1002_v61 = vpop.f32.mrb[32].mxu1 }
 0x2d1   : > { %v1091_v62 = vmul.f32 %v873_v59, %v873_v59  ;;  %v1127_v1 = vmul.f32 %v1002_v61, %v1002_v61  ;;  %v875_v2 = vpop.f32.mrb[25].mxu0  ;;  %v1004_v3 = vpop.f32.mrb[33].mxu1 }
 0x2d2   : > { %v877_v4 = vpop.f32.mrb[26].mxu0  ;;  %v1006_v5 = vpop.f32.mrb[34].mxu1 }
 0x2d3   : > { %v1163_v7 = vadd.f32 %v1127_v1, %v1091_v62  ;;  %v1093_v8 = vmul.f32 %v877_v4, %v877_v4  ;;  %v1129_v9 = vmul.f32 %v1006_v5, %v1006_v5  ;;  %v879_v10 = vpop.f32.mrb[27].mxu0  ;;  %v1008_v15 = vpop.f32.mrb[35].mxu1  ;;  %v3716_v1 = vmov -inf  }
 0x2d4   : > { %v4109_v2 = vsel %vm495_vm1, 0.0, %v3716_v1 }
 0x2d5   : > { %v1165_v16 = vadd.f32 %v1129_v9, %v1093_v8  ;;  %3417 = vrsqrt.f32 %v1163_v7  ;;  %vm1201_vm10 = vcmp.eq.f32.partialorder %v1163_v7, inf  ;;  %vm1203_vm12 = vcmp.eq.f32.partialorder %v1163_v7, 0.0 }
 0x2d6   : > { %v1204_v10 = vand.u32 2147483648, %v1163_v7 }
 0x2d7   : > { %3419 = vrsqrt.f32 %v1165_v16  ;;  %vm1215_vm13 = vcmp.eq.f32.partialorder %v1165_v16, inf  ;;  %vm1217_vm14 = vcmp.eq.f32.partialorder %v1165_v16, 0.0 }
 0x2d8   : > { %v883_v11 = vpop.f32.mrb[28].mxu0  ;;  %v1012_v14 = vpop.f32.mrb[36].mxu1 }
 0x2d9   : > { %v1095_v12 = vmul.f32 %v883_v11, %v883_v11  ;;  %v1131_v23 = vmul.f32 %v1012_v14, %v1012_v14  ;;  %v885_v22 = vpop.f32.mrb[29].mxu0  ;;  %v1014_v24 = vpop.f32.mrb[37].mxu1 }
 0x2da   : > { %v887_v40 = vpop.f32.mrb[30].mxu0  ;;  %v1016_v42 = vpop.f32.mrb[38].mxu1 }
 0x2db   : > { %v4100_v48 = vadd.f32 %v1131_v23, %v1095_v12  ;;  %v1097_v51 = vmul.f32 %v887_v40, %v887_v40  ;;  %v1133_v54 = vmul.f32 %v1016_v42, %v1016_v42  ;;  %v889_v56 = vpop.f32.mrb[31].mxu0  ;;  %v1018_v49 = vpop.f32.mrb[39].mxu1  ;;  %v1218_v23 = vand.u32 2147483648, %v1165_v16 }
 0x2dd   : > { %v4102_v57 = vadd.f32 %v1133_v54, %v1097_v51  ;;  %3421 = vrsqrt.f32 %v4100_v48  ;;  %vm1229_vm2 = vcmp.eq.f32.partialorder %v4100_v48, inf  ;;  %vm1231_vm4 = vcmp.eq.f32.partialorder %v4100_v48, 0.0 }
 0x2df   : > { %v3418_v52 = vpop.eup %3417  ;;  %3423 = vrsqrt.f32 %v4102_v57  ;;  %vm1243_vm6 = vcmp.eq.f32.partialorder %v4102_v57, inf  ;;  %vm1245_vm7 = vcmp.eq.f32.partialorder %v4102_v57, 0.0 }
 0x2e0   : > { %v893_v59 = vpop.f32.mrb[32].mxu0  ;;  %v1022_v61 = vpop.f32.mrb[40].mxu1  ;;  %v1200_v62 = vmul.f32 %v3418_v52, %v1163_v7 }
 0x2e1   : > { %v3420_v3 = vpop.eup %3419  ;;  %v1099_v4 = vmul.f32 %v893_v59, %v893_v59  ;;  %v1135_v5 = vmul.f32 %v1022_v61, %v1022_v61  ;;  %v895_v8 = vpop.f32.mrb[33].mxu0 }
 0x2e2   : > { %v1024_v9 = vpop.f32.mrb[41].mxu1  ;;  %v897_v15 = vpop.f32.mrb[34].mxu0  ;;  %v1202_v14 = vsel %vm1201_vm10, %v1163_v7, %v1200_v62  ;;  %v1214_v12 = vmul.f32 %v3420_v3, %v1165_v16 }
 0x2e3   : > { %v1026_v11 = vpop.f32.mrb[42].mxu1  ;;  %v4113_v22 = vadd.f32 %v1135_v5, %v1099_v4  ;;  %v1101_v24 = vmul.f32 %v897_v15, %v897_v15  ;;  %v4115_v51 = vsel %vm1203_vm12, %v1204_v10, %v1202_v14  ;;  %v899_v54 = vpop.f32.mrb[35].mxu0 }
 0x2e4   : > { %v1137_v40 = vmul.f32 %v1026_v11, %v1026_v11  ;;  %v1028_v42 = vpop.f32.mrb[43].mxu1  ;;  %v1451_v56 = vsel %vm194_vm9, %v4115_v51, 0.0  ;;  %v1216_v49 = vsel %vm1215_vm13, %v1165_v16, %v1214_v12  ;;  %v1232_v11 = vand.u32 2147483648, %v4100_v48 }
 0x2e5   : > { %3425 = vrsqrt.f32 %v4113_v22  ;;  %v1488_v52 = vmax.f32 %v1451_v56, %v4109_v2  ;;  %v4125_v59 = vsel %vm1217_vm14, %v1218_v23, %v1216_v49  ;;  %vm1257_vm10 = vcmp.eq.f32.partialorder %v4113_v22, inf }
 0x2e6   : > { %v4122_v7 = vadd.f32 %v1137_v40, %v1101_v24  ;;  %v1453_v61 = vsel %vm196_vm11, %v4125_v59, 0.0  ;;  %v1246_v40 = vand.u32 2147483648, %v4102_v57  ;;  %vm1259_vm12 = vcmp.eq.f32.partialorder %v4113_v22, 0.0 }
 0x2e7   : > { %v3422_v62 = vpop.eup %3421  ;;  %1489 = vmax.xlane.f32.xlu0 %v1488_v52  ;;  %v1492_v15 = vmax.f32 %v1453_v61, %v4109_v2  ;;  %vm204_vm13 = vcmp.le.s32.totalorder %v3865_v17, %v3906_v31 }
 0x2e8   : > { %3427 = vrsqrt.f32 %v4122_v7  ;;  %v903_v16 = vpop.f32.mrb[36].mxu0  ;;  %v1032_v1 = vpop.f32.mrb[44].mxu1  ;;  %v1228_v3 = vmul.f32 %v3422_v62, %v4100_v48  ;;  %vm1271_vm14 = vcmp.eq.f32.partialorder %v4122_v7, inf }
 0x2e9   : > { %v3424_v4 = vpop.eup %3423  ;;  %v1103_v5 = vmul.f32 %v903_v16, %v903_v16  ;;  %v1139_v8 = vmul.f32 %v1032_v1, %v1032_v1  ;;  %v905_v9 = vpop.f32.mrb[37].mxu0 }
 0x2ea   : > { %v1034_v10 = vpop.f32.mrb[45].mxu1  ;;  %v907_v14 = vpop.f32.mrb[38].mxu0  ;;  %v1230_v23 = vsel %vm1229_vm2, %v4100_v48, %v1228_v3  ;;  %v1242_v24 = vmul.f32 %v3424_v4, %v4102_v57  ;;  %vm1273_vm2 = vcmp.eq.f32.partialorder %v4122_v7, 0.0 }
 0x2eb   : > { %v1036_v12 = vpop.f32.mrb[46].mxu1  ;;  %v4145_v42 = vadd.f32 %v1139_v8, %v1103_v5  ;;  %v1105_v54 = vmul.f32 %v907_v14, %v907_v14  ;;  %1493 = vmax.xlane.f32.xlu0 %v1492_v15  ;;  %v4149_v52 = vsel %vm1231_vm4, %v1232_v11, %v1230_v23  ;;  %v909_v61 = vpop.f32.mrb[39].mxu0  ;;  %vm5194_vm4 = vcmp.le.s32.totalorder %v3865_v17, %v3917_v32 }
 0x2ec   : > { %v1141_v56 = vmul.f32 %v1036_v12, %v1036_v12  ;;  %v1038_v49 = vpop.f32.mrb[47].mxu1  ;;  %v1455_v62 = vsel %vm198_vm15, %v4149_v52, 0.0  ;;  %v1244_v16 = vsel %vm1243_vm6, %v4102_v57, %v1242_v24  ;;  %v1260_v24 = vand.u32 2147483648, %v4113_v22 }
 0x2ed   : > { %3429 = vrsqrt.f32 %v4145_v42  ;;  %v1496_v3 = vmax.f32 %v1455_v62, %v4109_v2  ;;  %v4161_v4 = vsel %vm1245_vm7, %v1246_v40, %v1244_v16  ;;  %v1274_v61 = vand.u32 2147483648, %v4122_v7 }
 0x2ee   : > { %v4158_v1 = vadd.f32 %v1141_v56, %v1105_v54  ;;  %v1457_v48 = vsel %vm200_vm5, %v4161_v4, 0.0  ;;  %vm1285_vm6 = vcmp.eq.f32.partialorder %v4145_v42, inf  ;;  %vm5193_vm7 = vcmp.le.s32.totalorder %v3865_v17, %v3925_v33 }
 0x2ef   : > { %v3426_v5 = vpop.eup %3425  ;;  %1497 = vmax.xlane.f32.xlu1 %v1496_v3  ;;  %v1500_v23 = vmax.f32 %v1457_v48, %v4109_v2 }
 0x2f0   : > { %3431 = vrsqrt.f32 %v4158_v1  ;;  %v913_v57 = vpop.f32.mrb[40].mxu0  ;;  %v1042_v8 = vpop.f32.mrb[48].mxu1  ;;  %v1256_v9 = vmul.f32 %v3426_v5, %v4113_v22 }
 0x2f1   : > { %v1107_v15 = vmul.f32 %v913_v57, %v913_v57  ;;  %v1143_v11 = vmul.f32 %v1042_v8, %v1042_v8  ;;  %v915_v14 = vpop.f32.mrb[41].mxu0  ;;  %v1044_v12 = vpop.f32.mrb[49].mxu1 }
 0x2f2   : > { %v3428_v10 = vpop.eup %3427  ;;  %v917_v40 = vpop.f32.mrb[42].mxu0  ;;  %v1258_v56 = vsel %vm1257_vm10, %v4113_v22, %v1256_v9  ;;  %vm1287_vm10 = vcmp.eq.f32.partialorder %v4145_v42, 0.0 }
 0x2f3   : > { %v1046_v54 = vpop.f32.mrb[50].mxu1  ;;  %v1270_v49 = vmul.f32 %v3428_v10, %v4122_v7  ;;  %v4181_v62 = vadd.f32 %v1143_v11, %v1107_v15  ;;  %v1109_v16 = vmul.f32 %v917_v40, %v917_v40  ;;  %1501 = vmax.xlane.f32.xlu1 %v1500_v23  ;;  %v4185_v48 = vsel %vm1259_vm12, %v1260_v24, %v1258_v56  ;;  %v919_v57 = vpop.f32.mrb[43].mxu0 }
 0x2f4   : > { %v1145_v3 = vmul.f32 %v1046_v54, %v1046_v54  ;;  %v1048_v5 = vpop.f32.mrb[51].mxu1  ;;  %v1459_v8 = vsel %vm202_vm8, %v4185_v48, 0.0  ;;  %vm1299_vm12 = vcmp.eq.f32.partialorder %v4158_v1, inf }
 0x2f5   : > { %v1272_v9 = vsel %vm1271_vm14, %v4122_v7, %v1270_v49  ;;  %3433 = vrsqrt.f32 %v4181_v62  ;;  %v1504_v15 = vmax.f32 %v1459_v8, %v4109_v2  ;;  %vm1301_vm14 = vcmp.eq.f32.partialorder %v4158_v1, 0.0 }
 0x2f6   : > { %v4194_v10 = vadd.f32 %v1145_v3, %v1109_v16  ;;  %v4197_v11 = vsel %vm1273_vm2, %v1274_v61, %v1272_v9  ;;  %v1288_v16 = vand.u32 2147483648, %v4145_v42  ;;  %v1302_v9 = vand.u32 2147483648, %v4158_v1 }
 0x2f7   : > { %v1461_v22 = vsel %vm204_vm13, %v4197_v11, 0.0  ;;  %v3430_v14 = vpop.eup %3429  ;;  %1505 = vmax.xlane.f32.xlu0 %v1504_v15  ;;  %vm5192_vm2 = vcmp.le.s32.totalorder %v3865_v17, %v3932_v34 }
 0x2f8   : > { %3435 = vrsqrt.f32 %v4194_v10  ;;  %v1508_v12 = vmax.f32 %v1461_v22, %v4109_v2  ;;  %v923_v7 = vpop.f32.mrb[44].mxu0  ;;  %v1052_v23 = vpop.f32.mrb[52].mxu1  ;;  %v1284_v24 = vmul.f32 %v3430_v14, %v4145_v42 }
 0x2f9   : > { %v1111_v54 = vmul.f32 %v923_v7, %v923_v7  ;;  %v1147_v56 = vmul.f32 %v1052_v23, %v1052_v23  ;;  %v1054_v49 = vpop.f32.mrb[53].mxu1  ;;  %v925_v61 = vpop.f32.mrb[45].mxu0 }
 0x2fa   : > { %v3432_v40 = vpop.eup %3431  ;;  %1509 = vmax.xlane.f32.xlu1 %v1508_v12  ;;  %v927_v3 = vpop.f32.mrb[46].mxu0  ;;  %v1286_v57 = vsel %vm1285_vm6, %v4145_v42, %v1284_v24  ;;  %vm1313_vm6 = vcmp.eq.f32.partialorder %v4181_v62, inf }
 0x2fb   : > { %v1056_v5 = vpop.f32.mrb[54].mxu1  ;;  %v1298_v8 = vmul.f32 %v3432_v40, %v4158_v1  ;;  %v4217_v15 = vadd.f32 %v1147_v56, %v1111_v54  ;;  %v1113_v22 = vmul.f32 %v927_v3, %v927_v3  ;;  %v4219_v7 = vsel %vm1287_vm10, %v1288_v16, %v1286_v57  ;;  %v929_v23 = vpop.f32.mrb[47].mxu0 }
 0x2fc   : > { %v1149_v14 = vmul.f32 %v1056_v5, %v1056_v5  ;;  %v1058_v12 = vpop.f32.mrb[55].mxu1  ;;  %v1463_v49 = vsel %vm5194_vm4, %v4219_v7, 0.0  ;;  %vm5180_vm10 = vcmp.le.s32.totalorder %v3865_v17, %v3939_v35 }
 0x2fd   : > { %v1300_v42 = vsel %vm1299_vm12, %v4158_v1, %v1298_v8  ;;  %3437 = vrsqrt.f32 %v4217_v15  ;;  %v1512_v40 = vmax.f32 %v1463_v49, %v4109_v2  ;;  %vm1315_vm12 = vcmp.eq.f32.partialorder %v4181_v62, 0.0 }
 0x2fe   : > { %v4228_v24 = vadd.f32 %v1149_v14, %v1113_v22  ;;  %v4231_v54 = vsel %vm1301_vm14, %v1302_v9, %v1300_v42  ;;  %v1316_v12 = vand.u32 2147483648, %v4181_v62  ;;  %vm1327_vm14 = vcmp.eq.f32.partialorder %v4194_v10, inf }
 0x2ff   : > { %v1465_v56 = vsel %vm5193_vm7, %v4231_v54, 0.0  ;;  %v3434_v61 = vpop.eup %3433  ;;  %1513 = vmax.xlane.f32.xlu0 %v1512_v40  ;;  %vm1343_vm3 = vcmp.eq.f32.partialorder %v4217_v15, 0.0 }
 0x300   : > { %3439 = vrsqrt.f32 %v4228_v24  ;;  %v1516_v16 = vmax.f32 %v1465_v56, %v4109_v2  ;;  %v933_v1 = vpop.f32.mrb[48].mxu0  ;;  %v1062_v3 = vpop.f32.mrb[56].mxu1  ;;  %v1312_v5 = vmul.f32 %v3434_v61, %v4181_v62  ;;  %v1330_v56 = vand.u32 2147483648, %v4194_v10 }
 0x301   : > { %v1115_v8 = vmul.f32 %v933_v1, %v933_v1  ;;  %v1151_v9 = vmul.f32 %v1062_v3, %v1062_v3  ;;  %v1064_v22 = vpop.f32.mrb[57].mxu1  ;;  %v935_v14 = vpop.f32.mrb[49].mxu0  ;;  %vm1355_vm0 = vcmp.eq.f32.partialorder %v4228_v24, inf }
 0x302   : > { %v3436_v57 = vpop.eup %3435  ;;  %1517 = vmax.xlane.f32.xlu1 %v1516_v16  ;;  %v937_v23 = vpop.f32.mrb[50].mxu0  ;;  %v1314_v42 = vsel %vm1313_vm6, %v4181_v62, %v1312_v5  ;;  %vm1329_vm6 = vcmp.eq.f32.partialorder %v4194_v10, 0.0 }
 0x303   : > { %v1066_v49 = vpop.f32.mrb[58].mxu1  ;;  %v1326_v40 = vmul.f32 %v3436_v57, %v4194_v10  ;;  %v4251_v61 = vadd.f32 %v1151_v9, %v1115_v8  ;;  %v1117_v1 = vmul.f32 %v937_v23, %v937_v23  ;;  %v4253_v22 = vsel %vm1315_vm12, %v1316_v12, %v1314_v42  ;;  %v939_v14 = vpop.f32.mrb[51].mxu0 }
 0x304   : > { %v1153_v3 = vmul.f32 %v1066_v49, %v1066_v49  ;;  %v1068_v16 = vpop.f32.mrb[59].mxu1  ;;  %v1467_v0 = vsel %vm5192_vm2, %v4253_v22, 0.0  ;;  %vm5179_vm12 = vcmp.le.s32.totalorder %v3865_v17, %v3946_v36 }
 0x305   : > { %v1328_v62 = vsel %vm1327_vm14, %v4194_v10, %v1326_v40  ;;  %3441 = vrsqrt.f32 %v4251_v61  ;;  %v1520_v57 = vmax.f32 %v1467_v0, %v4109_v2  ;;  %vm1341_vm14 = vcmp.eq.f32.partialorder %v4217_v15, inf }
 0x306   : > { %v4262_v5 = vadd.f32 %v1153_v3, %v1117_v1  ;;  %v4265_v8 = vsel %vm1329_vm6, %v1330_v56, %v1328_v62  ;;  %vm5178_vm6 = vcmp.le.s32.totalorder %v3865_v17, %v3953_v37  ;;  %v1344_v16 = vand.u32 2147483648, %v4217_v15 }
 0x307   : > { %v1469_v9 = vsel %vm5180_vm10, %v4265_v8, 0.0  ;;  %v3438_v12 = vpop.eup %3437  ;;  %1521 = vmax.xlane.f32.xlu0 %v1520_v57 }
 0x308   : > { %3443 = vrsqrt.f32 %v4262_v5  ;;  %v1524_v23 = vmax.f32 %v1469_v9, %v4109_v2  ;;  %v943_v10 = vpop.f32.mrb[52].mxu0  ;;  %v1072_v49 = vpop.f32.mrb[60].mxu1  ;;  %v1340_v0 = vmul.f32 %v3438_v12, %v4217_v15  ;;  %v1358_v12 = vand.u32 2147483648, %v4228_v24 }
 0x309   : > { %v1119_v40 = vmul.f32 %v943_v10, %v943_v10  ;;  %v1155_v56 = vmul.f32 %v1072_v49, %v1072_v49  ;;  %v1074_v1 = vpop.f32.mrb[61].mxu1  ;;  %v945_v3 = vpop.f32.mrb[53].mxu0  ;;  %vm1385_vm10 = vcmp.eq.f32.partialorder %v4262_v5, 0.0 }
 0x30a   : > { %v3440_v42 = vpop.eup %3439  ;;  %1525 = vmax.xlane.f32.xlu1 %v1524_v23  ;;  %v947_v14 = vpop.f32.mrb[54].mxu0  ;;  %v1342_v57 = vsel %vm1341_vm14, %v4217_v15, %v1340_v0  ;;  %vm1357_vm14 = vcmp.eq.f32.partialorder %v4228_v24, 0.0 }
 0x30b   : > { %v1076_v62 = vpop.f32.mrb[62].mxu1  ;;  %v1354_v9 = vmul.f32 %v3440_v42, %v4228_v24  ;;  %v4285_v44 = vadd.f32 %v1155_v56, %v1119_v40  ;;  %v1121_v10 = vmul.f32 %v947_v14, %v947_v14  ;;  %v4287_v1 = vsel %vm1343_vm3, %v1344_v16, %v1342_v57  ;;  %v949_v3 = vpop.f32.mrb[55].mxu0 }
 0x30c   : > { %v1157_v49 = vmul.f32 %v1076_v62, %v1076_v62  ;;  %v1078_v23 = vpop.f32.mrb[63].mxu1  ;;  %v1471_v43 = vsel %vm5179_vm12, %v4287_v1, 0.0  ;;  %vm5191_vm3 = vcmp.le.s32.totalorder %v3865_v17, %v3960_v38  ;;  %v1372_v57 = vand.u32 2147483648, %v4251_v61 }
 0x30d   : > { %v1356_v15 = vsel %vm1355_vm0, %v4228_v24, %v1354_v9  ;;  %3445 = vrsqrt.f32 %v4285_v44  ;;  %v1528_v42 = vmax.f32 %v1471_v43, %v4109_v2  ;;  %vm1369_vm0 = vcmp.eq.f32.partialorder %v4251_v61, inf }
 0x30e   : > { %v4296_v0 = vadd.f32 %v1157_v49, %v1121_v10  ;;  %v4299_v40 = vsel %vm1357_vm14, %v1358_v12, %v1356_v15  ;;  %vm5188_vm14 = vcmp.le.s32.totalorder %v3865_v17, %v3967_v39  ;;  %vm1383_vm12 = vcmp.eq.f32.partialorder %v4262_v5, inf }
 0x30f   : > { %v1473_v56 = vsel %vm5178_vm6, %v4299_v40, 0.0  ;;  %v3442_v16 = vpop.eup %3441  ;;  %1529 = vmax.xlane.f32.xlu0 %v1528_v42  ;;  %vm1371_vm6 = vcmp.eq.f32.partialorder %v4251_v61, 0.0  ;;  %v1386_v3 = vand.u32 2147483648, %v4262_v5 }
 0x310   : > { %3447 = vrsqrt.f32 %v4296_v0  ;;  %v1532_v24 = vmax.f32 %v1473_v56, %v4109_v2  ;;  %v953_v43 = vpop.f32.mrb[56].mxu0  ;;  %v1082_v14 = vpop.f32.mrb[64].mxu1  ;;  %v1368_v62 = vmul.f32 %v3442_v16, %v4251_v61 }
 0x311   : > { %v1123_v12 = vmul.f32 %v953_v43, %v953_v43  ;;  %v1159_v10 = vmul.f32 %v1082_v14, %v1082_v14  ;;  %v1084_v49 = vpop.f32.mrb[65].mxu1  ;;  %v955_v23 = vpop.f32.mrb[57].mxu0 }
 0x312   : > { %v3444_v9 = vpop.eup %3443  ;;  %1533 = vmax.xlane.f32.xlu1 %v1532_v24  ;;  %v1160_v15 = vmul.f32 %v1084_v49, %v1084_v49  ;;  %v1124_v42 = vmul.f32 %v955_v23, %v955_v23  ;;  %v957_v56 = vpop.f32.mrb[58].mxu0  ;;  %v1370_v29 = vsel %vm1369_vm0, %v4251_v61, %v1368_v62  ;;  %vm5190_vm0 = vcmp.le.s32.totalorder %v3865_v17, %v3993_v50 }
 0x313   : > { %v1086_v16 = vpop.f32.mrb[66].mxu1  ;;  %v1382_v21 = vmul.f32 %v3444_v9, %v4262_v5  ;;  %v4322_v26 = vadd.f32 %v1159_v10, %v1123_v12  ;;  %v1125_v43 = vmul.f32 %v957_v56, %v957_v56  ;;  %v959_v24 = vpop.f32.mrb[59].mxu0  ;;  %v4326_v60 = vsel %vm1371_vm6, %v1372_v57, %v1370_v29 }
 0x314   : > { %v1161_v14 = vmul.f32 %v1086_v16, %v1086_v16  ;;  %v1088_v53 = vpop.f32.mrb[67].mxu1  ;;  %v1196_v49 = vadd.f32 %v1160_v15, %v1124_v42  ;;  %v1126_v23 = vmul.f32 %v959_v24, %v959_v24  ;;  %v1475_v62 = vsel %vm5191_vm3, %v4326_v60, 0.0 }
 0x315   : > { %v1162_v19 = vmul.f32 %v1088_v53, %v1088_v53  ;;  %v1536_v9 = vmax.f32 %v1475_v62, %v4109_v2  ;;  %v1384_v12 = vsel %vm1383_vm12, %v4262_v5, %v1382_v21  ;;  %3449 = vrsqrt.f32 %v4322_v26 }
 0x316   : > { %v4332_v25 = vadd.f32 %v1161_v14, %v1125_v43  ;;  %3451 = vrsqrt.f32 %v1196_v49  ;;  %v4341_v53 = vsel %vm1385_vm10, %v1386_v3, %v1384_v12  ;;  %vm5189_vm12 = vcmp.le.s32.totalorder %v3865_v17, %v3974_v41 }
 0x317   : > { %v1198_v29 = vadd.f32 %v1162_v19, %v1126_v23  ;;  %v3446_v61 = vpop.eup %3445  ;;  %1537 = vmax.xlane.f32.xlu0 %v1536_v9  ;;  %v1477_v57 = vsel %vm5188_vm14, %v4341_v53, 0.0  ;;  %vm1397_vm6 = vcmp.eq.f32.partialorder %v4285_v44, inf  ;;  %v1400_v19 = vand.u32 2147483648, %v4285_v44 }
 0x318   : > { %v1540_v10 = vmax.f32 %v1477_v57, %v4109_v2  ;;  %v1396_v21 = vmul.f32 %v3446_v61, %v4285_v44  ;;  %vm1399_vm10 = vcmp.eq.f32.partialorder %v4285_v44, 0.0  ;;  %vm1411_vm14 = vcmp.eq.f32.partialorder %v4296_v0, inf }
 0x319   : > { %3453 = vrsqrt.f32 %v1198_v29  ;;  %v1414_v56 = vand.u32 2147483648, %v4296_v0  ;;  %v1428_v57 = vand.u32 2147483648, %v4322_v26  ;;  %vm1434_vm3 = vcmp.eq.f32.partialorder %v1196_v49, 0.0 }
 0x31a   : > { %v3448_v15 = vpop.eup %3447  ;;  %3455 = vrsqrt.f32 %v4332_v25  ;;  %1541 = vmax.xlane.f32.xlu1 %v1540_v10  ;;  %v1398_v5 = vsel %vm1397_vm6, %v4285_v44, %v1396_v21  ;;  %vm1413_vm6 = vcmp.eq.f32.partialorder %v4296_v0, 0.0  ;;  %v1435_v10 = vand.u32 2147483648, %v1196_v49 }
 0x31b   : > { %v1410_v3 = vmul.f32 %v3448_v15, %v4296_v0  ;;  %v4357_v42 = vsel %vm1399_vm10, %v1400_v19, %v1398_v5  ;;  %vm227_vm10 = vcmp.le.s32.totalorder %v3982_v46, %v3979_v45  ;;  %vm1439_vm2 = vcmp.eq.f32.partialorder %v4332_v25, inf }
 0x31c   : > { %v1479_v16 = vsel %vm5189_vm12, %v4357_v42, 0.0  ;;  %vm229_vm12 = vcmp.le.s32.totalorder %v3982_v46, %v4001_v55  ;;  %vm1446_vm7 = vcmp.eq.f32.partialorder %v1198_v29, inf  ;;  %vm1448_vm4 = vcmp.eq.f32.partialorder %v1198_v29, 0.0 }
 0x31d   : > { %v1412_v43 = vsel %vm1411_vm14, %v4296_v0, %v1410_v3  ;;  %v1544_v44 = vmax.f32 %v1479_v16, %v4109_v2  ;;  %vm1425_vm14 = vcmp.eq.f32.partialorder %v4322_v26, inf  ;;  %v1449_v16 = vand.u32 2147483648, %v1198_v29 }
 0x31e   : > { %v4370_v14 = vsel %vm1413_vm6, %v1414_v56, %v1412_v43  ;;  %vm1427_vm6 = vcmp.eq.f32.partialorder %v4322_v26, 0.0 }
 0x31f   : > { %v1481_v24 = vsel %vm5190_vm0, %v4370_v14, 0.0  ;;  %v3450_v23 = vpop.eup %3449  ;;  %1545 = vmax.xlane.f32.xlu0 %v1544_v44  ;;  %vm1432_vm0 = vcmp.eq.f32.partialorder %v1196_v49, inf  ;;  %v1442_v44 = vand.u32 2147483648, %v4332_v25 }
 0x320   : > { %v1548_v62 = vmax.f32 %v1481_v24, %v4109_v2  ;;  %v3452_v9 = vpop.eup %3451  ;;  %v1424_v12 = vmul.f32 %v3450_v23, %v4322_v26 }
 0x321   : > { %v1431_v0 = vmul.f32 %v3452_v9, %v1196_v49 }
 0x322   : > { %1549 = vmax.xlane.f32.xlu1 %v1548_v62  ;;  %v1426_v15 = vsel %vm1425_vm14, %v4322_v26, %v1424_v12  ;;  %vm5209_vm14 = vcmp.le.s32.totalorder %v3865_v17, %v3946_v36 }
 0x323   : > { %v3454_v61 = vpop.eup %3453  ;;  %v1433_v19 = vsel %vm1432_vm0, %v1196_v49, %v1431_v0  ;;  %v4397_v49 = vsel %vm1427_vm6, %v1428_v57, %v1426_v15  ;;  %vm5208_vm0 = vcmp.le.s32.totalorder %v3865_v17, %v3939_v35  ;;  %vm5210_vm6 = vcmp.le.s32.totalorder %v3865_v17, %v3953_v37 }
 0x324   : > { %v3456_v21 = vpop.eup %3455  ;;  %v1445_v5 = vmul.f32 %v3454_v61, %v1198_v29  ;;  %v4387_v3 = vsel %vm1434_vm3, %v1435_v10, %v1433_v19  ;;  %vm1441_vm3 = vcmp.eq.f32.partialorder %v4332_v25, 0.0 }
 0x325   : > { %v1438_v56 = vmul.f32 %v3456_v21, %v4332_v25  ;;  %v1484_v43 = vsel %vm227_vm10, %v4387_v3, 0.0 }
 0x326   : > { %v1447_v24 = vsel %vm1446_vm7, %v1198_v29, %v1445_v5  ;;  %v1551_v23 = vsel %vm495_vm1, %v1484_v43, -inf  ;;  %vm5206_vm7 = vcmp.le.s32.totalorder %v3865_v17, %v3925_v33 }
 0x327   : > { %v1440_v62 = vsel %vm1439_vm2, %v4332_v25, %v1438_v56  ;;  %v4401_v9 = vsel %vm1448_vm4, %v1449_v16, %v1447_v24  ;;  %v1552_v12 = vmax.f32 %v4397_v49, %v1551_v23  ;;  %vm5205_vm4 = vcmp.le.s32.totalorder %v3865_v17, %v3917_v32 }
 0x328   : > { %v1486_v0 = vsel %vm229_vm12, %v4401_v9, 0.0  ;;  %v4409_v29 = vsel %vm1441_vm3, %v1442_v44, %v1440_v62  ;;  %vm5207_vm2 = vcmp.le.s32.totalorder %v3865_v17, %v3932_v34  ;;  %vm5211_vm3 = vcmp.le.s32.totalorder %v3865_v17, %v3960_v38 }
 0x329   : > { %v1555_v26 = vsel %vm495_vm1, %v1486_v0, -inf  ;;  %1553 = vmax.xlane.f32.xlu0 %v1552_v12 }
 0x32a   : > { %v1556_v61 = vmax.f32 %v4409_v29, %v1555_v26 }
 0x32c   : > { %1557 = vmax.xlane.f32.xlu1 %v1556_v61 }
 0x374   : > { %v1490_v57 = vpop.xlane.xlu0 %1489 }
 0x375   : > { %v1559_v10 = vsub.f32 %v4115_v51, %v1490_v57 }
 0x377   : > { %v1595_v21 = vmul.f32 1.442695, %v1559_v10 }
 0x378   : > { %v1494_v15 = vpop.xlane.xlu0 %1493 }
 0x379   : > { %3457 = vpow2.f32 %v1595_v21  ;;  %v1561_v25 = vsub.f32 %v4125_v59, %v1494_v15 }
 0x37b   : > { %v1599_v19 = vmul.f32 1.442695, %v1561_v25 }
 0x37c   : > { %v1498_v5 = vpop.xlane.xlu1 %1497 }
 0x37d   : > { %3459 = vpow2.f32 %v1599_v19  ;;  %v1563_v56 = vsub.f32 %v4149_v52, %v1498_v5 }
 0x37f   : > { %v1603_v16 = vmul.f32 1.442695, %v1563_v56 }
 0x380   : > { %v1502_v43 = vpop.xlane.xlu1 %1501 }
 0x381   : > { %3461 = vpow2.f32 %v1603_v16  ;;  %v1565_v44 = vsub.f32 %v4161_v4, %v1502_v43 }
 0x383   : > { %v3458_v24 = vpop.eup %3457  ;;  %v1607_v23 = vmul.f32 1.442695, %v1565_v44 }
 0x384   : > { %v1506_v62 = vpop.xlane.xlu0 %1505  ;;  %v4420_v51 = vsel %vm194_vm9, %v3458_v24, 0.0 }
 0x385   : > { %3463 = vpow2.f32 %v1607_v23  ;;  %v1567_v59 = vsub.f32 %v4185_v48, %v1506_v62  ;;  %1705 = vadd.xlane.f32.xlu0 %v4420_v51 }
 0x387   : > { %v1510_v12 = vpop.xlane.xlu1 %1509  ;;  %v3460_v52 = vpop.eup %3459  ;;  %v1611_v0 = vmul.f32 1.442695, %v1567_v59 }
 0x388   : > { %v1569_v26 = vsub.f32 %v4197_v11, %v1510_v12  ;;  %v4428_v4 = vsel %vm196_vm11, %v3460_v52, 0.0 }
 0x389   : > { %3465 = vpow2.f32 %v1611_v0  ;;  %1709 = vadd.xlane.f32.xlu1 %v4428_v4 }
 0x38a   : > { %v1615_v61 = vmul.f32 1.442695, %v1569_v26 }
 0x38b   : > { %v3462_v57 = vpop.eup %3461 }
 0x38c   : > { %3467 = vpow2.f32 %v1615_v61  ;;  %v1514_v10 = vpop.xlane.xlu0 %1513  ;;  %v4434_v48 = vsel %vm198_vm15, %v3462_v57, 0.0 }
 0x38d   : > { %v1571_v21 = vsub.f32 %v4219_v7, %v1514_v10  ;;  %1713 = vadd.xlane.f32.xlu0 %v4434_v48 }
 0x38f   : > { %v1518_v11 = vpop.xlane.xlu1 %1517  ;;  %v3464_v15 = vpop.eup %3463  ;;  %v1619_v25 = vmul.f32 1.442695, %v1571_v21 }
 0x390   : > { %v1573_v19 = vsub.f32 %v4231_v54, %v1518_v11  ;;  %v4442_v5 = vsel %vm200_vm5, %v3464_v15, 0.0 }
 0x391   : > { %3469 = vpow2.f32 %v1619_v25  ;;  %1717 = vadd.xlane.f32.xlu1 %v4442_v5 }
 0x392   : > { %v1623_v56 = vmul.f32 1.442695, %v1573_v19 }
 0x393   : > { %v3466_v16 = vpop.eup %3465 }
 0x394   : > { %3471 = vpow2.f32 %v1623_v56  ;;  %v1522_v43 = vpop.xlane.xlu0 %1521  ;;  %v4448_v7 = vsel %vm202_vm8, %v3466_v16, 0.0 }
 0x395   : > { %v1575_v54 = vsub.f32 %v4253_v22, %v1522_v43  ;;  %1721 = vadd.xlane.f32.xlu0 %v4448_v7 }
 0x396   : > { %v3468_v44 = vpop.eup %3467 }
 0x397   : > { %v1526_v24 = vpop.xlane.xlu1 %1525  ;;  %v4455_v23 = vsel %vm204_vm13, %v3468_v44, 0.0  ;;  %v1627_v62 = vmul.f32 1.442695, %v1575_v54 }
 0x398   : > { %v1577_v59 = vsub.f32 %v4265_v8, %v1526_v24  ;;  %1725 = vadd.xlane.f32.xlu1 %v4455_v23 }
 0x399   : > { %3473 = vpow2.f32 %v1627_v62 }
 0x39a   : > { %v1631_v12 = vmul.f32 1.442695, %v1577_v59 }
 0x39b   : > { %v3470_v52 = vpop.eup %3469 }
 0x39c   : > { %3475 = vpow2.f32 %v1631_v12  ;;  %v1530_v0 = vpop.xlane.xlu0 %1529  ;;  %v4462_v22 = vsel %vm5205_vm4, %v3470_v52, 0.0  ;;  %vm5212_vm4 = vcmp.le.s32.totalorder %v3865_v17, %v3967_v39 }
 0x39d   : > { %v1579_v61 = vsub.f32 %v4287_v1, %v1530_v0  ;;  %1729 = vadd.xlane.f32.xlu0 %v4462_v22 }
 0x39e   : > { %v3472_v26 = vpop.eup %3471 }
 0x39f   : > { %v1534_v57 = vpop.xlane.xlu1 %1533  ;;  %v4469_v8 = vsel %vm5206_vm7, %v3472_v26, 0.0  ;;  %v1635_v10 = vmul.f32 1.442695, %v1579_v61  ;;  %vm5213_vm7 = vcmp.le.s32.totalorder %v3865_v17, %v3974_v41 }
 0x3a0   : > { %v1581_v21 = vsub.f32 %v4299_v40, %v1534_v57  ;;  %1733 = vadd.xlane.f32.xlu1 %v4469_v8 }
 0x3a1   : > { %3477 = vpow2.f32 %v1635_v10 }
 0x3a2   : > { %v1639_v11 = vmul.f32 1.442695, %v1581_v21 }
 0x3a3   : > { %v3474_v15 = vpop.eup %3473 }
 0x3a4   : > { %3479 = vpow2.f32 %v1639_v11  ;;  %v1538_v25 = vpop.xlane.xlu0 %1537  ;;  %v4476_v1 = vsel %vm5207_vm2, %v3474_v15, 0.0  ;;  %vm5214_vm2 = vcmp.le.s32.totalorder %v3865_v17, %v3993_v50 }
 0x3a5   : > { %v1583_v56 = vsub.f32 %v4326_v60, %v1538_v25  ;;  %1737 = vadd.xlane.f32.xlu0 %v4476_v1 }
 0x3a6   : > { %v3476_v19 = vpop.eup %3475 }
 0x3a7   : > { %v4483_v40 = vsel %vm5208_vm0, %v3476_v19, 0.0  ;;  %v1643_v16 = vmul.f32 1.442695, %v1583_v56  ;;  %v1542_v43 = vpop.xlane.xlu1 %1541  ;;  %vm5219_vm0 = vcmask 64512  }
 0x3a8   : > { %1741 = vadd.xlane.f32.xlu1 %v4483_v40  ;;  %v1585_v44 = vsub.f32 %v4341_v53, %v1542_v43 }
 0x3a9   : > { %3481 = vpow2.f32 %v1643_v16 }
 0x3aa   : > { %v1647_v54 = vmul.f32 1.442695, %v1585_v44 }
 0x3ab   : > { %v3478_v24 = vpop.eup %3477 }
 0x3ac   : > { %3483 = vpow2.f32 %v1647_v54  ;;  %v1546_v62 = vpop.xlane.xlu0 %1545  ;;  %v4490_v60 = vsel %vm5209_vm14, %v3478_v24, 0.0  ;;  %vm5221_vm14 = vmmov %vm5219_vm0 }
 0x3ad   : > { %v1587_v12 = vsub.f32 %v4357_v42, %v1546_v62  ;;  %1745 = vadd.xlane.f32.xlu0 %v4490_v60 }
 0x3ae   : > { %v3480_v59 = vpop.eup %3479 }
 0x3af   : > { %v1550_v52 = vpop.xlane.xlu1 %1549  ;;  %v4497_v53 = vsel %vm5210_vm6, %v3480_v59, 0.0  ;;  %v1651_v0 = vmul.f32 1.442695, %v1587_v12  ;;  %vm5223_vm6 = vcmask 1043456  }
 0x3b0   : > { %v1589_v26 = vsub.f32 %v4370_v14, %v1550_v52  ;;  %1749 = vadd.xlane.f32.xlu1 %v4497_v53 }
 0x3b1   : > { %3485 = vpow2.f32 %v1651_v0 }
 0x3b2   : > { %v1655_v61 = vmul.f32 1.442695, %v1589_v26 }
 0x3b3   : > { %v3482_v57 = vpop.eup %3481 }
 0x3b4   : > { %3487 = vpow2.f32 %v1655_v61  ;;  %v4504_v42 = vsel %vm5211_vm3, %v3482_v57, 0.0  ;;  %vm5224_vm3 = vmmov %vm5219_vm0 }
 0x3b5   : > { %1753 = vadd.xlane.f32.xlu0 %v4504_v42 }
 0x3b6   : > { %v3484_v10 = vpop.eup %3483  ;;  %v1554_v21 = vpop.xlane.xlu0 %1553 }
 0x3b7   : > { %v1591_v11 = vsub.f32 %v4397_v49, %v1554_v21  ;;  %v1592_v15 = vsub.f32 %v4387_v3, %v1554_v21  ;;  %v4512_v14 = vsel %vm5212_vm4, %v3484_v10, 0.0  ;;  %v5215_v21 = vld [vmem:[#allocation11_spill] sm:$0xff]  ;;  %vm5227_vm4 = vmmov %vm5223_vm6 }
 0x3b8   : > { %1757 = vadd.xlane.f32.xlu1 %v4512_v14 }
 0x3b9   : > { %v1558_v25 = vpop.xlane.xlu1 %1557  ;;  %v1659_v19 = vmul.f32 1.442695, %v1591_v11  ;;  %v1661_v56 = vmul.f32 1.442695, %v1592_v15  ;;  %v5216_v11 = vld [vmem:[#allocation10_spill] sm:$0xff]  ;;  %v5217_v15 = vld [vmem:[#allocation13_spill] sm:$0xff] }
 0x3ba   : > { %v1593_v16 = vsub.f32 %v4409_v29, %v1558_v25  ;;  %v1594_v43 = vsub.f32 %v4401_v9, %v1558_v25  ;;  %v5218_v25 = vld [vmem:[#allocation12_spill] sm:$0xff] }
 0x3bb   : > { %v3486_v44 = vpop.eup %3485  ;;  %3489 = vpow2.f32 %v1661_v56 }
 0x3bc   : > { %v1665_v54 = vmul.f32 1.442695, %v1594_v43  ;;  %v1663_v49 = vmul.f32 1.442695, %v1593_v16  ;;  %v4520_v3 = vsel %vm5213_vm7, %v3486_v44, 0.0  ;;  %3491 = vpow2.f32 %v1659_v19  ;;  %vm5228_vm7 = vmmov %vm5219_vm0 }
 0x3bd   : > { %1761 = vadd.xlane.f32.xlu0 %v4520_v3 }
 0x3be   : > { %v3488_v24 = vpop.eup %3487  ;;  %3493 = vpow2.f32 %v1665_v54 }
 0x3bf   : > { %v4526_v29 = vsel %vm5214_vm2, %v3488_v24, 0.0  ;;  %3495 = vpow2.f32 %v1663_v49  ;;  %vm5229_vm2 = vmmov %vm5219_vm0 }
 0x3c0   : > { %1765 = vadd.xlane.f32.xlu1 %v4526_v29 }
 0x3c5   : > { %v3490_v9 = vpop.eup %3489 }
 0x3c6   : > { %v4529_v62 = vpop.eup %3491  ;;  %v4534_v59 = vsel %vm227_vm10, %v3490_v9, 0.0 }
 0x3c7   : > { %v1767_v52 = vsel %vm495_vm1, %v4534_v59, 0.0 }
 0x3c8   : > { %v3494_v12 = vpop.eup %3493  ;;  %v1768_v0 = vadd.f32 %v4529_v62, %v1767_v52 }
 0x3c9   : > { %v4542_v26 = vsel %vm229_vm12, %v3494_v12, 0.0  ;;  %v4544_v61 = vpop.eup %3495 }
 0x3ca   : > { %v1771_v57 = vsel %vm495_vm1, %v4542_v26, 0.0  ;;  %1769 = vadd.xlane.f32.xlu0 %v1768_v0 }
 0x3cb   : > { %v1772_v10 = vadd.f32 %v4544_v61, %v1771_v57 }
 0x3cd   : > { %1773 = vadd.xlane.f32.xlu1 %v1772_v10 }
 0x3de   : > { %1931 = vrot.lane.b32.xlu1 %v4034_v47, %s3717_s27 }
 0x3e0   : > { %1929 = vrot.lane.b32.xlu0 %v4026_v58, %s3717_s27 }
 0x3e2   : > { %1933 = vrot.lane.b32.xlu1 %v4037_v63, %s3717_s27 }
 0x3e4   : > { %1937 = vrot.lane.b32.xlu0 %v4053_v13, %s3717_s27 }
 0x3e6   : > { %1935 = vrot.lane.b32.xlu1 %v4045_v6, %s3717_s27 }
 0x3e8   : > { %1941 = vrot.lane.b32.xlu0 %v5215_v21, %s3717_s27 }
 0x3ea   : > { %1939 = vrot.lane.b32.xlu1 %v5216_v11, %s3717_s27 }
 0x3ec   : > { %1945 = vrot.lane.b32.xlu0 %v5217_v15, %s3717_s27 }
 0x3ee   : > { %1943 = vrot.lane.b32.xlu1 %v5218_v25, %s3717_s27 }
 0x412   : > { %v1706_v19 = vpop.xlane.xlu0 %1705 }
 0x413   : > { %3497 = vrcp.f32 %v1706_v19 }
 0x416   : > { %v1710_v56 = vpop.xlane.xlu1 %1709 }
 0x417   : > { %3499 = vrcp.f32 %v1710_v56 }
 0x41a   : > { %v1714_v47 = vpop.xlane.xlu0 %1713 }
 0x41b   : > { %3501 = vrcp.f32 %v1714_v47 }
 0x41d   : > { %v3498_v63 = vpop.eup %3497 }
 0x41e   : > { %v1718_v58 = vpop.xlane.xlu1 %1717  ;;  %v1794_v6 = vmul.f32 0.0, %v3498_v63  ;;  %v1793_v44 = vmul.f32 %v3498_v63, %v4420_v51 }
 0x41f   : > { %3503 = vrcp.f32 %v1718_v58 }
 0x421   : > { %v3500_v13 = vpop.eup %3499 }
 0x422   : > { %v1722_v16 = vpop.xlane.xlu0 %1721  ;;  %v1796_v43 = vmul.f32 0.0, %v3500_v13  ;;  %v1795_v54 = vmul.f32 %v3500_v13, %v4428_v4 }
 0x423   : > { %3505 = vrcp.f32 %v1722_v16 }
 0x424   : > { %v1830_v24 = vpack.c.bf16 %v1796_v43, %v1794_v6  ;;  %v1829_v9 = vpack.c.bf16 %v1795_v54, %v1793_v44 }
 0x425   : > { %v1726_v49 = vpop.xlane.xlu1 %1725  ;;  %v3502_v12 = vpop.eup %3501 }
 0x426   : > { %3507 = vrcp.f32 %v1726_v49  ;;  %3302 = vmatprep.subr.msk.bf16.mxu0 %vm495_vm1, %v1830_v24  ;;  %v1798_v57 = vmul.f32 0.0, %v3502_v12  ;;  %v1797_v21 = vmul.f32 %v3502_v12, %v4434_v48 }
 0x427   : > { %1878 = vmatpush1.bf16.xpose.msra.mxu0 %v1829_v9 }
 0x429   : > { %v3504_v52 = vpop.eup %3503 }
 0x42a   : > { %v1730_v0 = vpop.xlane.xlu0 %1729  ;;  %v1800_v10 = vmul.f32 0.0, %v3504_v52  ;;  %v1799_v11 = vmul.f32 %v3504_v52, %v4442_v5 }
 0x42b   : > { %3509 = vrcp.f32 %v1730_v0 }
 0x42c   : > { %v1832_v4 = vpack.c.bf16 %v1800_v10, %v1798_v57  ;;  %v1831_v15 = vpack.c.bf16 %v1799_v11, %v1797_v21 }
 0x42d   : > { %v1734_v51 = vpop.xlane.xlu1 %1733  ;;  %v3506_v25 = vpop.eup %3505 }
 0x42e   : > { %3511 = vrcp.f32 %v1734_v51  ;;  %3303 = vmatprep.subr.msk.bf16.mxu0 %vm495_vm1, %v1832_v4  ;;  %v1802_v56 = vmul.f32 0.0, %v3506_v25  ;;  %v1801_v48 = vmul.f32 %v3506_v25, %v4448_v7 }
 0x42f   : > { %1880 = vmatpush1.bf16.xpose.msra.mxu0 %v1831_v15 }
 0x430   : > { %v3508_v19 = vpop.eup %3507 }
 0x431   : > { %v1804_v47 = vmul.f32 0.0, %v3508_v19  ;;  %v1803_v58 = vmul.f32 %v3508_v19, %v4455_v23 }
 0x432   : > { %v1738_v63 = vpop.xlane.xlu0 %1737 }
 0x433   : > { %v1834_v13 = vpack.c.bf16 %v1804_v47, %v1802_v56  ;;  %3513 = vrcp.f32 %v1738_v63  ;;  %v1833_v6 = vpack.c.bf16 %v1803_v58, %v1801_v48 }
 0x435   : > { %3304 = vmatprep.subr.msk.bf16.mxu0 %vm495_vm1, %v1834_v13  ;;  %v1742_v5 = vpop.xlane.xlu1 %1741  ;;  %v3510_v16 = vpop.eup %3509 }
 0x436   : > { %3515 = vrcp.f32 %v1742_v5  ;;  %v1806_v44 = vmul.f32 0.0, %v3510_v16  ;;  %v1805_v23 = vmul.f32 %v3510_v16, %v4462_v22 }
 0x437   : > { %1882 = vmatpush1.bf16.xpose.msra.mxu0 %v1833_v6 }
 0x438   : > { %v3512_v43 = vpop.eup %3511 }
 0x439   : > { %v1808_v54 = vmul.f32 0.0, %v3512_v43  ;;  %v1807_v49 = vmul.f32 %v3512_v43, %v4469_v8 }
 0x43a   : > { %v1746_v24 = vpop.xlane.xlu0 %1745 }
 0x43b   : > { %v1836_v9 = vpack.c.bf16 %v1808_v54, %v1806_v44  ;;  %3517 = vrcp.f32 %v1746_v24  ;;  %v1835_v52 = vpack.c.bf16 %v1807_v49, %v1805_v23 }
 0x43d   : > { %3305 = vmatprep.subr.msk.bf16.mxu0 %vm495_vm1, %v1836_v9  ;;  %v1750_v7 = vpop.xlane.xlu1 %1749  ;;  %v3514_v12 = vpop.eup %3513 }
 0x43e   : > { %3519 = vrcp.f32 %v1750_v7  ;;  %v1810_v57 = vmul.f32 0.0, %v3514_v12  ;;  %v1809_v8 = vmul.f32 %v3514_v12, %v4476_v1 }
 0x43f   : > { %1884 = vmatpush1.bf16.xpose.msra.mxu0 %v1835_v52 }
 0x440   : > { %v3516_v0 = vpop.eup %3515 }
 0x441   : > { %v1812_v10 = vmul.f32 0.0, %v3516_v0  ;;  %v1811_v21 = vmul.f32 %v3516_v0, %v4483_v40 }
 0x442   : > { %v1754_v11 = vpop.xlane.xlu0 %1753 }
 0x443   : > { %v1838_v51 = vpack.c.bf16 %v1812_v10, %v1810_v57  ;;  %3521 = vrcp.f32 %v1754_v11  ;;  %v1837_v15 = vpack.c.bf16 %v1811_v21, %v1809_v8  ;;  %v5220_v57 = vmov 0  }
 0x445   : > { %3306 = vmatprep.subr.msk.bf16.mxu0 %vm495_vm1, %v1838_v51  ;;  %v3518_v22 = vpop.eup %3517  ;;  %v1758_v4 = vpop.xlane.xlu1 %1757 }
 0x446   : > { %3523 = vrcp.f32 %v1758_v4  ;;  %v1814_v19 = vmul.f32 0.0, %v3518_v22  ;;  %v1813_v40 = vmul.f32 %v3518_v22, %v4490_v60 }
 0x447   : > { %1886 = vmatpush1.bf16.xpose.msra.mxu0 %v1837_v15  ;;  %v5222_v15 = vld [vmem:[#allocation7_spill] sm:$0xff] }
 0x448   : > { %v3520_v25 = vpop.eup %3519 }
 0x449   : > { %v1816_v56 = vmul.f32 0.0, %v3520_v25  ;;  %v1815_v47 = vmul.f32 %v3520_v25, %v4497_v53  ;;  %v1950_v25 = vrot.slane %v5222_v15, 4 }
 0x44a   : > { %v1762_v58 = vpop.xlane.xlu0 %1761 }
 0x44b   : > { %v1840_v63 = vpack.c.bf16 %v1816_v56, %v1814_v19  ;;  %3525 = vrcp.f32 %v1762_v58  ;;  %v1839_v13 = vpack.c.bf16 %v1815_v47, %v1813_v40 }
 0x44d   : > { %3307 = vmatprep.subr.msk.bf16.mxu0 %vm495_vm1, %v1840_v63  ;;  %v1766_v1 = vpop.xlane.xlu1 %1765  ;;  %v3522_v48 = vpop.eup %3521 }
 0x44e   : > { %3527 = vrcp.f32 %v1766_v1  ;;  %v1818_v16 = vmul.f32 0.0, %v3522_v48  ;;  %v1817_v53 = vmul.f32 %v3522_v48, %v4504_v42 }
 0x44f   : > { %1888 = vmatpush1.bf16.xpose.msra.mxu0 %v1839_v13  ;;  %v5240_v13 = vld [vmem:[#allocation9_spill] sm:$0xff] }
 0x450   : > { %v3524_v5 = vpop.eup %3523  ;;  %v2999_v48 = vrot.slane %v5240_v13, 4 }
 0x451   : > { %v1820_v6 = vmul.f32 0.0, %v3524_v5  ;;  %v1819_v43 = vmul.f32 %v3524_v5, %v4512_v14 }
 0x453   : > { %v1842_v44 = vpack.c.bf16 %v1820_v6, %v1818_v16  ;;  %v1841_v49 = vpack.c.bf16 %v1819_v43, %v1817_v53 }
 0x455   : > { %v3526_v54 = vpop.eup %3525  ;;  %3308 = vmatprep.subr.msk.bf16.mxu0 %vm495_vm1, %v1842_v44 }
 0x456   : > { %v1822_v9 = vmul.f32 0.0, %v3526_v54  ;;  %v1821_v14 = vmul.f32 %v3526_v54, %v4520_v3 }
 0x457   : > { %1890 = vmatpush1.bf16.xpose.msra.mxu0 %v1841_v49  ;;  %v1770_v24 = vpop.xlane.xlu0 %1769 }
 0x458   : > { %v3528_v60 = vpop.eup %3527  ;;  %3529 = vrcp.f32 %v1770_v24 }
 0x459   : > { %v1824_v23 = vmul.f32 0.0, %v3528_v60  ;;  %v1823_v7 = vmul.f32 %v3528_v60, %v4526_v29 }
 0x45a   : > { %v1774_v12 = vpop.xlane.xlu1 %1773 }
 0x45b   : > { %v1844_v52 = vpack.c.bf16 %v1824_v23, %v1822_v9  ;;  %3531 = vrcp.f32 %v1774_v12  ;;  %v1930_v0 = vpop.permute.xlu0 %1929  ;;  %v1843_v42 = vpack.c.bf16 %v1823_v7, %v1821_v14 }
 0x45c   : > { %3323 = vmatmul.mubr.msk.bf16.vlgmr.msra.gmra.mrb[68].mxu1 %vm5219_vm0, %v1930_v0 }
 0x45d   : > { %3309 = vmatprep.subr.msk.bf16.mxu0 %vm495_vm1, %v1844_v52  ;;  %2159 = vmatprep.mubr.bf16.mxu1 %v5220_v57 }
 0x45e   : > { %v1932_v21 = vpop.permute.xlu1 %1931 }
 0x45f   : > { %1892 = vmatpush1.bf16.xpose.msra.mxu0 %v1843_v42  ;;  %v1938_v47 = vpop.permute.xlu0 %1937 }
 0x462   : > { %v3530_v10 = vpop.eup %3529  ;;  %v1934_v19 = vpop.permute.xlu1 %1933 }
 0x463   : > { %v1826_v29 = vmul.f32 %v3530_v10, %v4534_v59  ;;  %v1825_v3 = vmul.f32 %v3530_v10, %v4529_v62  ;;  %v5225_v59 = vld [vmem:[#allocation6_spill] sm:$0xff]  ;;  %v5226_v62 = vld [vmem:[#allocation8_spill] sm:$0xff]  ;;  %v1942_v63 = vpop.permute.xlu0 %1941 }
 0x464   : > { %3324 = vmatmul.mubr.msk.bf16.gmra.mrb[72].mxu1 %vm5221_vm14, %v1932_v21  ;;  %vm5230_vm14 = vmmov %vm5219_vm0 }
 0x465   : > { %v3532_v11 = vpop.eup %3531  ;;  %2169 = vmatprep.mubr.bf16.mxu1 %v5220_v57 }
 0x466   : > { %v1828_v51 = vmul.f32 %v3532_v11, %v4542_v26  ;;  %v1827_v8 = vmul.f32 %v3532_v11, %v4544_v61  ;;  %v1949_v26 = vrot.slane %v5225_v59, 4  ;;  %v1936_v56 = vpop.permute.xlu1 %1935 }
 0x467   : > { %v1946_v1 = vpop.permute.xlu0 %1945 }
 0x468   : > { %v1846_v22 = vpack.c.bf16 %v1828_v51, %v1826_v29  ;;  %v1845_v4 = vpack.c.bf16 %v1827_v8, %v1825_v3  ;;  %v1979_v61 = vsel %vm5227_vm4, %v1949_v26, 0  ;;  %vm5233_vm4 = vmmov %vm5219_vm0 }
 0x46a   : > { %3310 = vmatprep.subr.msk.bf16.mxu0 %vm495_vm1, %v1846_v22  ;;  %v1940_v58 = vpop.permute.xlu1 %1939 }
 0x46b   : > { %1894 = vmatpush1.bf16.xpose.msra.mxu0 %v1845_v4 }
 0x46c   : > { %3312 = vmatprep.subr.msk.bf16.mxu0 %vm5223_vm6, %v1950_v25  ;;  %3325 = vmatmul.mubr.msk.bf16.gmra.mrb[76].mxu1 %vm5224_vm3, %v1934_v19  ;;  %vm5231_vm6 = vmmov %vm5219_vm0 }
 0x46d   : > { %2179 = vmatprep.mubr.bf16.mxu1 %v5220_v57  ;;  %vm5232_vm3 = vmmov %vm5219_vm0 }
 0x46e   : > { %v1944_v40 = vpop.permute.xlu1 %1943 }
 0x472   : > { %1910 = vmatmul.mubr.bf16.vlgmr.msra.gmra.mrb[60].mxu0 %v5226_v62 }
 0x473   : > { %1985 = vmatpush1.bf16.msra.mxu0 %v1979_v61  ;;  %2016 = vmatprep.mubr.bf16.mxu0 %v5220_v57 }
 0x474   : > { %3326 = vmatmul.mubr.msk.bf16.gmra.mrb[80].mxu1 %vm5228_vm7, %v1936_v56  ;;  %vm5234_vm7 = vmmov %vm5219_vm0 }
 0x475   : > { %2189 = vmatprep.mubr.bf16.mxu1 %v5220_v57 }
 0x47a   : > { %3313 = vmatmul.mubr.msk.bf16.vlgmr.msra.gmra.mrb[64].mxu0 %vm5229_vm2, %v1930_v0  ;;  %vm5235_vm2 = vmmov %vm5219_vm0 }
 0x47b   : > { %2026 = vmatprep.mubr.bf16.mxu0 %v5220_v57 }
 0x47c   : > { %3327 = vmatmul.mubr.msk.bf16.gmra.mrb[84].mxu1 %vm5219_vm0, %v1938_v47 }
 0x47d   : > { %2199 = vmatprep.mubr.bf16.mxu1 %v5220_v57 }
 0x482   : > { %3314 = vmatmul.mubr.msk.bf16.gmra.mrb[68].mxu0 %vm5230_vm14, %v1932_v21  ;;  %vm5236_vm14 = vmmov %vm5219_vm0 }
 0x483   : > { %2036 = vmatprep.mubr.bf16.mxu0 %v5220_v57 }
 0x484   : > { %3328 = vmatmul.mubr.msk.bf16.gmra.mrb[88].mxu1 %vm5231_vm6, %v1940_v58  ;;  %vm5237_vm6 = vmmov %vm5219_vm0 }
 0x485   : > { %2209 = vmatprep.mubr.bf16.mxu1 %v5220_v57 }
 0x48a   : > { %3315 = vmatmul.mubr.msk.bf16.gmra.mrb[72].mxu0 %vm5232_vm3, %v1934_v19  ;;  %vm5238_vm3 = vmmov %vm5219_vm0 }
 0x48b   : > { %2046 = vmatprep.mubr.bf16.mxu0 %v5220_v57 }
 0x48c   : > { %3329 = vmatmul.mubr.msk.bf16.gmra.mrb[92].mxu1 %vm5233_vm4, %v1942_v63  ;;  %vm5239_vm4 = vmmov %vm5219_vm0 }
 0x48d   : > { %2219 = vmatprep.mubr.bf16.mxu1 %v5220_v57 }
 0x492   : > { %3316 = vmatmul.mubr.msk.bf16.gmra.mrb[76].mxu0 %vm5234_vm7, %v1936_v56  ;;  %vm5241_vm7 = vmmov %vm5219_vm0 }
 0x493   : > { %2056 = vmatprep.mubr.bf16.mxu0 %v5220_v57 }
 0x494   : > { %3330 = vmatmul.mubr.msk.bf16.gmra.mrb[96].mxu1 %vm5235_vm2, %v1944_v40 }
 0x495   : > { %2229 = vmatprep.mubr.bf16.mxu1 %v5220_v57 }
 0x49a   : > { %3317 = vmatmul.mubr.msk.bf16.gmra.mrb[80].mxu0 %vm5219_vm0, %v1938_v47 }
 0x49b   : > { %2066 = vmatprep.mubr.bf16.mxu0 %v5220_v57 }
 0x49c   : > { %3331 = vmatmul.mubr.msk.bf16.gmra.mrb[100].mxu1 %vm5236_vm14, %v1946_v1 }
 0x4a2   : > { %3318 = vmatmul.mubr.msk.bf16.gmra.mrb[84].mxu0 %vm5237_vm6, %v1940_v58 }
 0x4a3   : > { %2076 = vmatprep.mubr.bf16.mxu0 %v5220_v57 }
 0x4aa   : > { %3319 = vmatmul.mubr.msk.bf16.gmra.mrb[88].mxu0 %vm5238_vm3, %v1942_v63 }
 0x4ab   : > { %2086 = vmatprep.mubr.bf16.mxu0 %v5220_v57 }
 0x4b2   : > { %3320 = vmatmul.mubr.msk.bf16.gmra.mrb[92].mxu0 %vm5239_vm4, %v1944_v40 }
 0x4b3   : > { %2096 = vmatprep.mubr.bf16.mxu0 %v5220_v57 }
 0x4ba   : > { %3321 = vmatmul.mubr.msk.bf16.gmra.mrb[96].mxu0 %vm5241_vm7, %v1946_v1 }
 0x4bb   : > { %3341 = vmatprep.mubr.msk.bf16.mxu0 %vm495_vm1, %v2999_v48 }
 0x52f   : > { %v2151_v5 = vpop.f32.mrb[68].mxu1 }
 0x530   : > { %v2153_v16 = vpop.f32.mrb[69].mxu1  ;;  %v2276_v11 = vmul.f32 %v2151_v5, %v2151_v5 }
 0x531   : > { %v2155_v6 = vpop.f32.mrb[70].mxu1 }
 0x532   : > { %v2157_v43 = vpop.f32.mrb[71].mxu1  ;;  %v2278_v8 = vmul.f32 %v2155_v6, %v2155_v6 }
 0x537   : > { %v2161_v44 = vpop.f32.mrb[72].mxu1 }
 0x538   : > { %v2163_v53 = vpop.f32.mrb[73].mxu1  ;;  %v2280_v47 = vmul.f32 %v2161_v44, %v2161_v44 }
 0x539   : > { %v2165_v54 = vpop.f32.mrb[74].mxu1 }
 0x53a   : > { %v2167_v49 = vpop.f32.mrb[75].mxu1  ;;  %v2282_v1 = vmul.f32 %v2165_v54, %v2165_v54 }
 0x53f   : > { %v2171_v60 = vpop.f32.mrb[76].mxu1 }
 0x540   : > { %v2173_v24 = vpop.f32.mrb[77].mxu1  ;;  %v2284_v44 = vmul.f32 %v2171_v60, %v2171_v60 }
 0x541   : > { %v2175_v9 = vpop.f32.mrb[78].mxu1 }
 0x542   : > { %v2177_v23 = vpop.f32.mrb[79].mxu1 }
 0x545   : > { %v1911_v7 = vpop.f32.mrb[60].mxu0 }
 0x546   : > { %1918 = vst [vmem:[#allocation2] sm:$0xff] %v1911_v7  ;;  %v1913_v12 = vpop.f32.mrb[61].mxu0 }
 0x547   : > { %1919 = vst.msk [vmem:[#allocation2 + $0x8] sm:$0xff] %vm495_vm1, %v1913_v12  ;;  %v1915_v52 = vpop.f32.mrb[62].mxu0  ;;  %v4630_v0 = vpop.f32.mrb[80].mxu1  ;;  %v2286_v12 = vmul.f32 %v2175_v9, %v2175_v9 }
 0x548   : > { %v1916_v14 = vpop.f32.mrb[63].mxu0  ;;  %v2183_v42 = vpop.f32.mrb[81].mxu1 }
 0x549   : > { %v4632_v57 = vpop.f32.mrb[82].mxu1 }
 0x54a   : > { %v2187_v10 = vpop.f32.mrb[83].mxu1 }
 0x54d   : > { %v2018_v21 = vpop.f32.mrb[64].mxu0 }
 0x54e   : > { %v2240_v29 = vmul.f32 %v2018_v21, %v2018_v21  ;;  %v2020_v51 = vpop.f32.mrb[65].mxu0 }
 0x54f   : > { %v2022_v3 = vpop.f32.mrb[66].mxu0  ;;  %v4634_v25 = vpop.f32.mrb[84].mxu1 }
 0x550   : > { %v2312_v22 = vadd.f32 %v2276_v11, %v2240_v29  ;;  %v2242_v4 = vmul.f32 %v2022_v3, %v2022_v3  ;;  %v2024_v15 = vpop.f32.mrb[67].mxu0  ;;  %v2193_v19 = vpop.f32.mrb[85].mxu1 }
 0x551   : > { %v4636_v26 = vpop.f32.mrb[86].mxu1 }
 0x552   : > { %3533 = vrsqrt.f32 %v2312_v22  ;;  %v2314_v59 = vadd.f32 %v2278_v8, %v2242_v4  ;;  %v2197_v61 = vpop.f32.mrb[87].mxu1  ;;  %vm2350_vm2 = vcmp.eq.f32.partialorder %v2312_v22, inf  ;;  %v2353_v42 = vand.u32 2147483648, %v2312_v22 }
 0x553   : > { %vm2352_vm0 = vcmp.eq.f32.partialorder %v2312_v22, 0.0 }
 0x554   : > { %3535 = vrsqrt.f32 %v2314_v59  ;;  %vm2364_vm14 = vcmp.eq.f32.partialorder %v2314_v59, inf  ;;  %v2367_v4 = vand.u32 2147483648, %v2314_v59  ;;  %vm2366_vm6 = vcmp.eq.f32.partialorder %v2314_v59, 0.0 }
 0x555   : > { %v2028_v56 = vpop.f32.mrb[68].mxu0 }
 0x556   : > { %v2244_v58 = vmul.f32 %v2028_v56, %v2028_v56  ;;  %v2030_v63 = vpop.f32.mrb[69].mxu0 }
 0x557   : > { %v2032_v40 = vpop.f32.mrb[70].mxu0  ;;  %v4640_v16 = vpop.f32.mrb[88].mxu1 }
 0x558   : > { %v4638_v13 = vadd.f32 %v2280_v47, %v2244_v58  ;;  %v2246_v48 = vmul.f32 %v2032_v40, %v2032_v40  ;;  %v2034_v5 = vpop.f32.mrb[71].mxu0  ;;  %v2203_v6 = vpop.f32.mrb[89].mxu1 }
 0x559   : > { %v4645_v53 = vpop.f32.mrb[90].mxu1 }
 0x55a   : > { %3537 = vrsqrt.f32 %v4638_v13  ;;  %v4643_v43 = vadd.f32 %v2282_v1, %v2246_v48  ;;  %v2207_v49 = vpop.f32.mrb[91].mxu1  ;;  %v2288_v1 = vmul.f32 %v4630_v0, %v4630_v0  ;;  %vm2378_vm3 = vcmp.eq.f32.partialorder %v4638_v13, inf }
 0x55b   : > { %v2290_v49 = vmul.f32 %v4632_v57, %v4632_v57  ;;  %vm2380_vm4 = vcmp.eq.f32.partialorder %v4638_v13, 0.0 }
 0x55c   : > { %v3534_v24 = vpop.eup %3533  ;;  %3539 = vrsqrt.f32 %v4643_v43  ;;  %vm2392_vm7 = vcmp.eq.f32.partialorder %v4643_v43, inf }
 0x55d   : > { %v2038_v23 = vpop.f32.mrb[72].mxu0  ;;  %v2349_v54 = vmul.f32 %v3534_v24, %v2312_v22 }
 0x55e   : > { %v3536_v7 = vpop.eup %3535  ;;  %v2248_v52 = vmul.f32 %v2038_v23, %v2038_v23  ;;  %v2040_v14 = vpop.f32.mrb[73].mxu0  ;;  %v2381_v23 = vand.u32 2147483648, %v4638_v13 }
 0x55f   : > { %v2042_v10 = vpop.f32.mrb[74].mxu0  ;;  %v2351_v21 = vsel %vm2350_vm2, %v2312_v22, %v2349_v54  ;;  %v2363_v11 = vmul.f32 %v3536_v7, %v2314_v59  ;;  %v4650_v8 = vpop.f32.mrb[92].mxu1  ;;  %vm2394_vm2 = vcmp.eq.f32.partialorder %v4643_v43, 0.0 }
 0x560   : > { %v4648_v29 = vadd.f32 %v2284_v44, %v2248_v52  ;;  %v2250_v51 = vmul.f32 %v2042_v10, %v2042_v10  ;;  %v2044_v3 = vpop.f32.mrb[75].mxu0  ;;  %v4652_v60 = vsel %vm2352_vm0, %v2353_v42, %v2351_v21  ;;  %v2213_v15 = vpop.f32.mrb[93].mxu1  ;;  %v2395_v10 = vand.u32 2147483648, %v4643_v43 }
 0x561   : > { %v2600_v9 = vsel %vm194_vm9, %v4652_v60, 0.0  ;;  %v2365_v19 = vsel %vm2364_vm14, %v2314_v59, %v2363_v11  ;;  %v4661_v61 = vpop.f32.mrb[94].mxu1 }
 0x562   : > { %3541 = vrsqrt.f32 %v4648_v29  ;;  %v4659_v22 = vadd.f32 %v2286_v12, %v2250_v51  ;;  %v2637_v56 = vmax.f32 %v2600_v9, %v4109_v2  ;;  %v4664_v47 = vsel %vm2366_vm6, %v2367_v4, %v2365_v19  ;;  %v2217_v58 = vpop.f32.mrb[95].mxu1 }
 0x563   : > { %v2602_v63 = vsel %vm196_vm11, %v4664_v47, 0.0  ;;  %vm2406_vm0 = vcmp.eq.f32.partialorder %v4648_v29, inf  ;;  %vm2408_vm14 = vcmp.eq.f32.partialorder %v4648_v29, 0.0 }
 0x564   : > { %v3538_v40 = vpop.eup %3537  ;;  %3543 = vrsqrt.f32 %v4659_v22  ;;  %2638 = vmax.xlane.f32.xlu1 %v2637_v56  ;;  %v2641_v59 = vmax.f32 %v2602_v63, %v4109_v2  ;;  %vm2420_vm6 = vcmp.eq.f32.partialorder %v4659_v22, inf }
 0x565   : > { %v2048_v48 = vpop.f32.mrb[76].mxu0  ;;  %v2377_v5 = vmul.f32 %v3538_v40, %v4638_v13 }
 0x566   : > { %v3540_v6 = vpop.eup %3539  ;;  %v2252_v24 = vmul.f32 %v2048_v48, %v2048_v48  ;;  %2642 = vmax.xlane.f32.xlu0 %v2641_v59  ;;  %v2050_v44 = vpop.f32.mrb[77].mxu0 }
 0x567   : > { %v2052_v54 = vpop.f32.mrb[78].mxu0  ;;  %v2379_v7 = vsel %vm2378_vm3, %v4638_v13, %v2377_v5  ;;  %v2391_v0 = vmul.f32 %v3540_v6, %v4643_v43  ;;  %v4685_v14 = vpop.f32.mrb[96].mxu1  ;;  %v2409_v5 = vand.u32 2147483648, %v4648_v29  ;;  %v2294_v6 = vmul.f32 %v4636_v26, %v4636_v26 }
 0x568   : > { %v4683_v12 = vadd.f32 %v2288_v1, %v2252_v24  ;;  %v2254_v52 = vmul.f32 %v2052_v54, %v2052_v54  ;;  %v2054_v57 = vpop.f32.mrb[79].mxu0  ;;  %v4687_v42 = vsel %vm2380_vm4, %v2381_v23, %v2379_v7  ;;  %v2223_v21 = vpop.f32.mrb[97].mxu1  ;;  %vm2422_vm3 = vcmp.eq.f32.partialorder %v4659_v22, 0.0 }
 0x569   : > { %v2604_v13 = vsel %vm198_vm15, %v4687_v42, 0.0  ;;  %v2393_v11 = vsel %vm2392_vm7, %v4643_v43, %v2391_v0  ;;  %v4699_v3 = vpop.f32.mrb[98].mxu1  ;;  %v2292_v43 = vmul.f32 %v4634_v25, %v4634_v25  ;;  %v2423_v57 = vand.u32 2147483648, %v4659_v22 }
 0x56a   : > { %3545 = vrsqrt.f32 %v4683_v12  ;;  %v4697_v51 = vadd.f32 %v2290_v49, %v2254_v52  ;;  %v2645_v4 = vmax.f32 %v2604_v13, %v4109_v2  ;;  %v4702_v15 = vsel %vm2394_vm2, %v2395_v10, %v2393_v11  ;;  %v2227_v9 = vpop.f32.mrb[99].mxu1 }
 0x56b   : > { %v2606_v19 = vsel %vm200_vm5, %v4702_v15, 0.0  ;;  %vm2434_vm4 = vcmp.eq.f32.partialorder %v4683_v12, inf  ;;  %vm2436_vm7 = vcmp.eq.f32.partialorder %v4683_v12, 0.0 }
 0x56c   : > { %v3542_v56 = vpop.eup %3541  ;;  %3547 = vrsqrt.f32 %v4697_v51  ;;  %2646 = vmax.xlane.f32.xlu0 %v2645_v4  ;;  %v2649_v48 = vmax.f32 %v2606_v19, %v4109_v2  ;;  %vm2448_vm2 = vcmp.eq.f32.partialorder %v4697_v51, inf }
 0x56d   : > { %v2058_v58 = vpop.f32.mrb[80].mxu0  ;;  %v2405_v63 = vmul.f32 %v3542_v56, %v4648_v29  ;;  %v2296_v56 = vmul.f32 %v4640_v16, %v4640_v16 }
 0x56e   : > { %v3544_v40 = vpop.eup %3543  ;;  %v2256_v59 = vmul.f32 %v2058_v58, %v2058_v58  ;;  %v2060_v1 = vpop.f32.mrb[81].mxu0 }
 0x56f   : > { %v2062_v49 = vpop.f32.mrb[82].mxu0  ;;  %v2407_v24 = vsel %vm2406_vm0, %v4648_v29, %v2405_v63  ;;  %v2419_v25 = vmul.f32 %v3544_v40, %v4659_v22  ;;  %v4722_v54 = vpop.f32.mrb[100].mxu1  ;;  %v2298_v40 = vmul.f32 %v4645_v53, %v4645_v53  ;;  %vm5242_vm0 = vcmp.le.s32.totalorder %v3865_v17, %v3917_v32 }
 0x570   : > { %v4720_v44 = vadd.f32 %v2292_v43, %v2256_v59  ;;  %v2258_v23 = vmul.f32 %v2062_v49, %v2062_v49  ;;  %2650 = vmax.xlane.f32.xlu0 %v2649_v48  ;;  %v2064_v7 = vpop.f32.mrb[83].mxu0  ;;  %v4724_v0 = vsel %vm2408_vm14, %v2409_v5, %v2407_v24  ;;  %v4727_v52 = vpop.f32.mrb[101].mxu1  ;;  %v2437_v48 = vand.u32 2147483648, %v4683_v12 }
 0x571   : > { %v2608_v26 = vsel %vm202_vm8, %v4724_v0, 0.0  ;;  %v2421_v29 = vsel %vm2420_vm6, %v4659_v22, %v2419_v25  ;;  %v4738_v21 = vpop.f32.mrb[102].mxu1  ;;  %vm2450_vm14 = vcmp.eq.f32.partialorder %v4697_v51, 0.0  ;;  %vm5243_vm6 = vcmp.le.s32.totalorder %v3865_v17, %v3925_v33 }
 0x572   : > { %3549 = vrsqrt.f32 %v4720_v44  ;;  %v4736_v10 = vadd.f32 %v2294_v6, %v2258_v23  ;;  %v2653_v13 = vmax.f32 %v2608_v26, %v4109_v2  ;;  %v4742_v11 = vpop.f32.mrb[103].mxu1  ;;  %v4744_v4 = vsel %vm2422_vm3, %v2423_v57, %v2421_v29 }
 0x573   : > { %v2610_v19 = vsel %vm204_vm13, %v4744_v4, 0.0  ;;  %v2451_v23 = vand.u32 2147483648, %v4697_v51  ;;  %vm2462_vm3 = vcmp.eq.f32.partialorder %v4720_v44, inf }
 0x574   : > { %v3546_v9 = vpop.eup %3545  ;;  %3551 = vrsqrt.f32 %v4736_v10  ;;  %2654 = vmax.xlane.f32.xlu1 %v2653_v13  ;;  %v2657_v58 = vmax.f32 %v2610_v19, %v4109_v2 }
 0x575   : > { %v2068_v43 = vpop.f32.mrb[84].mxu0  ;;  %v2433_v22 = vmul.f32 %v3546_v9, %v4683_v12 }
 0x576   : > { %v3548_v63 = vpop.eup %3547  ;;  %v2260_v59 = vmul.f32 %v2068_v43, %v2068_v43  ;;  %v2070_v1 = vpop.f32.mrb[85].mxu0  ;;  %2658 = vmax.xlane.f32.xlu0 %v2657_v58 }
 0x577   : > { %v2072_v5 = vpop.f32.mrb[86].mxu0  ;;  %v2435_v6 = vsel %vm2434_vm4, %v4683_v12, %v2433_v22  ;;  %v2447_v16 = vmul.f32 %v3548_v63, %v4697_v51  ;;  %v2302_v22 = vmul.f32 %v4661_v61, %v4661_v61  ;;  %vm2464_vm4 = vcmp.eq.f32.partialorder %v4720_v44, 0.0 }
 0x578   : > { %v4763_v49 = vadd.f32 %v2296_v56, %v2260_v59  ;;  %v2262_v24 = vmul.f32 %v2072_v5, %v2072_v5  ;;  %v2074_v53 = vpop.f32.mrb[87].mxu0  ;;  %v4765_v25 = vsel %vm2436_vm7, %v2437_v48, %v2435_v6  ;;  %v2465_v59 = vand.u32 2147483648, %v4720_v44 }
 0x579   : > { %v2612_v7 = vsel %vm5242_vm0, %v4765_v25, 0.0  ;;  %v2449_v26 = vsel %vm2448_vm2, %v4697_v51, %v2447_v16  ;;  %v2300_v51 = vmul.f32 %v4650_v8, %v4650_v8  ;;  %vm2476_vm7 = vcmp.eq.f32.partialorder %v4736_v10, inf }
 0x57a   : > { %3553 = vrsqrt.f32 %v4763_v49  ;;  %v4775_v12 = vadd.f32 %v2298_v40, %v2262_v24  ;;  %v2661_v29 = vmax.f32 %v2612_v7, %v4109_v2  ;;  %v4778_v57 = vsel %vm2450_vm14, %v2451_v23, %v2449_v26 }
 0x57b   : > { %v2614_v13 = vsel %vm5243_vm6, %v4778_v57, 0.0  ;;  %v2479_v24 = vand.u32 2147483648, %v4736_v10  ;;  %vm5244_vm2 = vcmp.le.s32.totalorder %v3865_v17, %v3932_v34  ;;  %vm2478_vm0 = vcmp.eq.f32.partialorder %v4736_v10, 0.0 }
 0x57c   : > { %v3550_v9 = vpop.eup %3549  ;;  %3555 = vrsqrt.f32 %v4775_v12  ;;  %2662 = vmax.xlane.f32.xlu1 %v2661_v29  ;;  %v2665_v19 = vmax.f32 %v2614_v13, %v4109_v2  ;;  %vm5245_vm14 = vcmp.le.s32.totalorder %v3865_v17, %v3939_v35  ;;  %vm2490_vm6 = vcmp.eq.f32.partialorder %v4763_v49, inf }
 0x57d   : > { %v2078_v56 = vpop.f32.mrb[88].mxu0  ;;  %v2461_v43 = vmul.f32 %v3550_v9, %v4720_v44 }
 0x57e   : > { %v3552_v58 = vpop.eup %3551  ;;  %v2264_v63 = vmul.f32 %v2078_v56, %v2078_v56  ;;  %2666 = vmax.xlane.f32.xlu0 %v2665_v19  ;;  %v2080_v40 = vpop.f32.mrb[89].mxu0 }
 0x57f   : > { %v2082_v1 = vpop.f32.mrb[90].mxu0  ;;  %v2463_v48 = vsel %vm2462_vm3, %v4720_v44, %v2461_v43  ;;  %v2475_v8 = vmul.f32 %v3552_v58, %v4736_v10  ;;  %v2306_v43 = vmul.f32 %v4699_v3, %v4699_v3  ;;  %vm2492_vm3 = vcmp.eq.f32.partialorder %v4763_v49, 0.0 }
 0x580   : > { %v4797_v5 = vadd.f32 %v2300_v51, %v2264_v63  ;;  %v2266_v6 = vmul.f32 %v2082_v1, %v2082_v1  ;;  %v2084_v61 = vpop.f32.mrb[91].mxu0  ;;  %v4799_v16 = vsel %vm2464_vm4, %v2465_v59, %v2463_v48  ;;  %v2493_v63 = vand.u32 2147483648, %v4763_v49 }
 0x581   : > { %v2616_v53 = vsel %vm5244_vm2, %v4799_v16, 0.0  ;;  %v2477_v23 = vsel %vm2476_vm7, %v4736_v10, %v2475_v8  ;;  %v2304_v10 = vmul.f32 %v4685_v14, %v4685_v14  ;;  %vm2504_vm4 = vcmp.eq.f32.partialorder %v4775_v12, inf }
 0x582   : > { %3557 = vrsqrt.f32 %v4797_v5  ;;  %v4809_v44 = vadd.f32 %v2302_v22, %v2266_v6  ;;  %v2669_v7 = vmax.f32 %v2616_v53, %v4109_v2  ;;  %v4812_v26 = vsel %vm2478_vm0, %v2479_v24, %v2477_v23 }
 0x583   : > { %v2618_v29 = vsel %vm5245_vm14, %v4812_v26, 0.0  ;;  %v2507_v6 = vand.u32 2147483648, %v4775_v12  ;;  %vm5246_vm7 = vcmp.le.s32.totalorder %v3865_v17, %v3946_v36  ;;  %vm2506_vm2 = vcmp.eq.f32.partialorder %v4775_v12, 0.0 }
 0x584   : > { %v3554_v13 = vpop.eup %3553  ;;  %3559 = vrsqrt.f32 %v4809_v44  ;;  %2670 = vmax.xlane.f32.xlu1 %v2669_v7  ;;  %v2673_v9 = vmax.f32 %v2618_v29, %v4109_v2  ;;  %vm5247_vm0 = vcmp.le.s32.totalorder %v3865_v17, %v3953_v37  ;;  %vm2518_vm14 = vcmp.eq.f32.partialorder %v4797_v5, inf }
 0x585   : > { %v2088_v19 = vpop.f32.mrb[92].mxu0  ;;  %v2489_v51 = vmul.f32 %v3554_v13, %v4763_v49  ;;  %v2308_v13 = vmul.f32 %v4722_v54, %v4722_v54 }
 0x586   : > { %v3556_v56 = vpop.eup %3555  ;;  %v2268_v58 = vmul.f32 %v2088_v19, %v2088_v19  ;;  %2674 = vmax.xlane.f32.xlu0 %v2673_v9  ;;  %v2090_v22 = vpop.f32.mrb[93].mxu0  ;;  %v2311_v19 = vmul.f32 %v4742_v11, %v4742_v11 }
 0x587   : > { %v2092_v40 = vpop.f32.mrb[94].mxu0  ;;  %v2491_v59 = vsel %vm2490_vm6, %v4763_v49, %v2489_v51  ;;  %v2503_v14 = vmul.f32 %v3556_v56, %v4775_v12  ;;  %vm2520_vm6 = vcmp.eq.f32.partialorder %v4797_v5, 0.0 }
 0x588   : > { %v4831_v1 = vadd.f32 %v2304_v10, %v2268_v58  ;;  %v2270_v48 = vmul.f32 %v2092_v40, %v2092_v40  ;;  %v2094_v3 = vpop.f32.mrb[95].mxu0  ;;  %v4833_v8 = vsel %vm2492_vm3, %v2493_v63, %v2491_v59  ;;  %v2310_v10 = vmul.f32 %v4738_v21, %v4738_v21 }
 0x589   : > { %v2620_v61 = vsel %vm5246_vm7, %v4833_v8, 0.0  ;;  %v2505_v24 = vsel %vm2504_vm4, %v4775_v12, %v2503_v14  ;;  %v2309_v12 = vmul.f32 %v4727_v52, %v4727_v52  ;;  %v2521_v58 = vand.u32 2147483648, %v4797_v5 }
 0x58a   : > { %3561 = vrsqrt.f32 %v4831_v1  ;;  %v4843_v49 = vadd.f32 %v2306_v43, %v2270_v48  ;;  %v2677_v53 = vmax.f32 %v2620_v61, %v4109_v2  ;;  %v4846_v23 = vsel %vm2506_vm2, %v2507_v6, %v2505_v24 }
 0x58b   : > { %v2622_v7 = vsel %vm5247_vm0, %v4846_v23, 0.0  ;;  %vm2532_vm3 = vcmp.eq.f32.partialorder %v4809_v44, inf  ;;  %vm2534_vm4 = vcmp.eq.f32.partialorder %v4809_v44, 0.0  ;;  %v2535_v3 = vand.u32 2147483648, %v4809_v44 }
 0x58c   : > { %v3558_v29 = vpop.eup %3557  ;;  %3563 = vrsqrt.f32 %v4843_v49  ;;  %2678 = vmax.xlane.f32.xlu1 %v2677_v53  ;;  %v2681_v9 = vmax.f32 %v2622_v7, %v4109_v2  ;;  %vm5248_vm7 = vcmp.le.s32.totalorder %v3865_v17, %v3960_v38  ;;  %vm5249_vm2 = vcmp.le.s32.totalorder %v3865_v17, %v3967_v39 }
 0x58d   : > { %v2098_v51 = vpop.f32.mrb[96].mxu0  ;;  %v2517_v56 = vmul.f32 %v3558_v29, %v4797_v5  ;;  %vm2546_vm0 = vcmp.eq.f32.partialorder %v4831_v1, inf }
 0x58e   : > { %v3560_v54 = vpop.eup %3559  ;;  %v2272_v43 = vmul.f32 %v2098_v51, %v2098_v51  ;;  %2682 = vmax.xlane.f32.xlu0 %v2681_v9  ;;  %v2100_v52 = vpop.f32.mrb[97].mxu0 }
 0x58f   : > { %v2273_v22 = vmul.f32 %v2100_v52, %v2100_v52  ;;  %v2102_v21 = vpop.f32.mrb[98].mxu0  ;;  %v2519_v63 = vsel %vm2518_vm14, %v4797_v5, %v2517_v56  ;;  %v2531_v11 = vmul.f32 %v3560_v54, %v4809_v44  ;;  %v2549_v56 = vand.u32 2147483648, %v4831_v1 }
 0x590   : > { %v4870_v40 = vadd.f32 %v2308_v13, %v2272_v43  ;;  %v2274_v59 = vmul.f32 %v2102_v21, %v2102_v21  ;;  %v2104_v14 = vpop.f32.mrb[99].mxu0  ;;  %v4872_v48 = vsel %vm2520_vm6, %v2521_v58, %v2519_v63  ;;  %vm2548_vm14 = vcmp.eq.f32.partialorder %v4831_v1, 0.0 }
 0x591   : > { %v2345_v6 = vadd.f32 %v2309_v12, %v2273_v22  ;;  %v2275_v61 = vmul.f32 %v2104_v14, %v2104_v14  ;;  %v2624_v24 = vsel %vm5248_vm7, %v4872_v48, 0.0  ;;  %v2533_v5 = vsel %vm2532_vm3, %v4809_v44, %v2531_v11 }
 0x592   : > { %v4880_v53 = vadd.f32 %v2310_v10, %v2274_v59  ;;  %v2685_v7 = vmax.f32 %v2624_v24, %v4109_v2  ;;  %v4883_v29 = vsel %vm2534_vm4, %v2535_v3, %v2533_v5  ;;  %3565 = vrsqrt.f32 %v4870_v40 }
 0x593   : > { %3567 = vrsqrt.f32 %v2345_v6  ;;  %v2347_v13 = vadd.f32 %v2311_v19, %v2275_v61  ;;  %v2626_v12 = vsel %vm5249_vm2, %v4883_v29, 0.0  ;;  %vm2560_vm6 = vcmp.eq.f32.partialorder %v4843_v49, inf }
 0x594   : > { %v3562_v9 = vpop.eup %3561  ;;  %2686 = vmax.xlane.f32.xlu1 %v2685_v7  ;;  %v2689_v51 = vmax.f32 %v2626_v12, %v4109_v2  ;;  %v2563_v52 = vand.u32 2147483648, %v4843_v49  ;;  %vm5250_vm3 = vcmp.le.s32.totalorder %v3865_v17, %v3974_v41  ;;  %vm2562_vm4 = vcmp.eq.f32.partialorder %v4843_v49, 0.0 }
 0x595   : > { %3569 = vrsqrt.f32 %v2347_v13  ;;  %v2545_v44 = vmul.f32 %v3562_v9, %v4831_v1  ;;  %vm5251_vm7 = vcmp.le.s32.totalorder %v3865_v17, %v3993_v50  ;;  %vm2574_vm2 = vcmp.eq.f32.partialorder %v4870_v40, inf }
 0x596   : > { %v3564_v10 = vpop.eup %3563  ;;  %2690 = vmax.xlane.f32.xlu0 %v2689_v51  ;;  %3571 = vrsqrt.f32 %v4880_v53  ;;  %v2577_v24 = vand.u32 2147483648, %v4870_v40  ;;  %v2584_v5 = vand.u32 2147483648, %v2345_v6 }
 0x597   : > { %v2547_v19 = vsel %vm2546_vm0, %v4831_v1, %v2545_v44  ;;  %v2559_v54 = vmul.f32 %v3564_v10, %v4843_v49  ;;  %vm2576_vm0 = vcmp.eq.f32.partialorder %v4870_v40, 0.0  ;;  %v2598_v10 = vand.u32 2147483648, %v2347_v13 }
 0x598   : > { %v4898_v43 = vsel %vm2548_vm14, %v2549_v56, %v2547_v19  ;;  %vm2581_vm14 = vcmp.eq.f32.partialorder %v2345_v6, inf  ;;  %v2591_v19 = vand.u32 2147483648, %v4880_v53 }
 0x599   : > { %v2628_v58 = vsel %vm5250_vm3, %v4898_v43, 0.0  ;;  %v2561_v22 = vsel %vm2560_vm6, %v4843_v49, %v2559_v54  ;;  %vm2583_vm6 = vcmp.eq.f32.partialorder %v2345_v6, 0.0  ;;  %vm2588_vm3 = vcmp.eq.f32.partialorder %v4880_v53, inf }
 0x59a   : > { %v2693_v21 = vmax.f32 %v2628_v58, %v4109_v2  ;;  %v4909_v1 = vsel %vm2562_vm4, %v2563_v52, %v2561_v22  ;;  %vm2595_vm4 = vcmp.eq.f32.partialorder %v2347_v13, inf }
 0x59b   : > { %v2630_v63 = vsel %vm5251_vm7, %v4909_v1, 0.0  ;;  %vm2597_vm7 = vcmp.eq.f32.partialorder %v2347_v13, 0.0 }
 0x59c   : > { %v3566_v11 = vpop.eup %3565  ;;  %2694 = vmax.xlane.f32.xlu1 %v2693_v21  ;;  %v2697_v59 = vmax.f32 %v2630_v63, %v4109_v2 }
 0x59d   : > { %v3568_v14 = vpop.eup %3567  ;;  %v2573_v3 = vmul.f32 %v3566_v11, %v4870_v40 }
 0x59e   : > { %2698 = vmax.xlane.f32.xlu0 %v2697_v59  ;;  %v2580_v49 = vmul.f32 %v3568_v14, %v2345_v6 }
 0x59f   : > { %v3570_v61 = vpop.eup %3569  ;;  %v2575_v12 = vsel %vm2574_vm2, %v4870_v40, %v2573_v3  ;;  %vm2590_vm2 = vcmp.eq.f32.partialorder %v4880_v53, 0.0 }
 0x5a0   : > { %v3572_v7 = vpop.eup %3571  ;;  %v2582_v9 = vsel %vm2581_vm14, %v2345_v6, %v2580_v49  ;;  %v2594_v2 = vmul.f32 %v3570_v61, %v2347_v13  ;;  %v4932_v6 = vsel %vm2576_vm0, %v2577_v24, %v2575_v12  ;;  %vm5258_vm0 = vcmp.le.s32.totalorder %v3865_v17, %v3960_v38 }
 0x5a1   : > { %v4922_v51 = vsel %vm2583_vm6, %v2584_v5, %v2582_v9  ;;  %v2587_v44 = vmul.f32 %v3572_v7, %v4880_v53  ;;  %vm5259_vm14 = vcmp.le.s32.totalorder %v3865_v17, %v3967_v39  ;;  %vm5260_vm6 = vcmp.le.s32.totalorder %v3865_v17, %v3974_v41 }
 0x5a2   : > { %v2633_v56 = vsel %vm227_vm10, %v4922_v51, 0.0  ;;  %v2596_v54 = vsel %vm2595_vm4, %v2347_v13, %v2594_v2 }
 0x5a3   : > { %v2700_v52 = vsel %vm495_vm1, %v2633_v56, -inf  ;;  %v2589_v58 = vsel %vm2588_vm3, %v4880_v53, %v2587_v44  ;;  %v4936_v22 = vsel %vm2597_vm7, %v2598_v10, %v2596_v54  ;;  %vm5261_vm3 = vcmp.le.s32.totalorder %v3865_v17, %v3993_v50 }
 0x5a4   : > { %v2701_v21 = vmax.f32 %v4932_v6, %v2700_v52  ;;  %v2635_v63 = vsel %vm229_vm12, %v4936_v22, 0.0  ;;  %v4944_v13 = vsel %vm2590_vm2, %v2591_v19, %v2589_v58 }
 0x5a5   : > { %v2704_v40 = vsel %vm495_vm1, %v2635_v63, -inf }
 0x5a6   : > { %2702 = vmax.xlane.f32.xlu1 %v2701_v21  ;;  %v2705_v11 = vmax.f32 %v4944_v13, %v2704_v40 }
 0x5a8   : > { %2706 = vmax.xlane.f32.xlu0 %v2705_v11 }
 0x5f1   : > { %v2639_v59 = vpop.xlane.xlu1 %2638 }
 0x5f2   : > { %v2708_v14 = vsub.f32 %v4652_v60, %v2639_v59 }
 0x5f3   : > { %v2643_v3 = vpop.xlane.xlu0 %2642 }
 0x5f4   : > { %v2744_v49 = vmul.f32 1.442695, %v2708_v14  ;;  %v2710_v53 = vsub.f32 %v4664_v47, %v2643_v3 }
 0x5f6   : > { %3573 = vpow2.f32 %v2744_v49  ;;  %v2748_v61 = vmul.f32 1.442695, %v2710_v53 }
 0x5f8   : > { %3575 = vpow2.f32 %v2748_v61 }
 0x5f9   : > { %v2647_v24 = vpop.xlane.xlu0 %2646 }
 0x5fa   : > { %v2712_v5 = vsub.f32 %v4687_v42, %v2647_v24 }
 0x5fc   : > { %v2752_v7 = vmul.f32 1.442695, %v2712_v5 }
 0x5fd   : > { %v2651_v12 = vpop.xlane.xlu0 %2650 }
 0x5fe   : > { %3577 = vpow2.f32 %v2752_v7  ;;  %v2714_v9 = vsub.f32 %v4702_v15, %v2651_v12 }
 0x600   : > { %v3574_v2 = vpop.eup %3573  ;;  %v2756_v44 = vmul.f32 1.442695, %v2714_v9 }
 0x601   : > { %v2655_v10 = vpop.xlane.xlu1 %2654  ;;  %v4955_v60 = vsel %vm194_vm9, %v3574_v2, 0.0  ;;  %vm5252_vm9 = vcmp.le.s32.totalorder %v3865_v17, %v3917_v32 }
 0x602   : > { %v3576_v47 = vpop.eup %3575  ;;  %3579 = vpow2.f32 %v2756_v44  ;;  %v2716_v56 = vsub.f32 %v4724_v0, %v2655_v10  ;;  %2854 = vadd.xlane.f32.xlu1 %v4955_v60 }
 0x603   : > { %v4962_v42 = vsel %vm196_vm11, %v3576_v47, 0.0  ;;  %v2659_v19 = vpop.xlane.xlu0 %2658  ;;  %vm5253_vm11 = vcmp.le.s32.totalorder %v3865_v17, %v3925_v33 }
 0x604   : > { %v2760_v15 = vmul.f32 1.442695, %v2716_v56  ;;  %2858 = vadd.xlane.f32.xlu0 %v4962_v42  ;;  %v2718_v54 = vsub.f32 %v4744_v4, %v2659_v19 }
 0x606   : > { %3581 = vpow2.f32 %v2760_v15  ;;  %v2764_v18 = vmul.f32 1.442695, %v2718_v54 }
 0x608   : > { %v3578_v52 = vpop.eup %3577  ;;  %3583 = vpow2.f32 %v2764_v18 }
 0x609   : > { %v2663_v58 = vpop.xlane.xlu1 %2662  ;;  %v4969_v0 = vsel %vm198_vm15, %v3578_v52, 0.0  ;;  %vm5254_vm15 = vcmp.le.s32.totalorder %v3865_v17, %v3932_v34 }
 0x60a   : > { %v2720_v27 = vsub.f32 %v4765_v25, %v2663_v58  ;;  %2862 = vadd.xlane.f32.xlu1 %v4969_v0 }
 0x60b   : > { %v2667_v21 = vpop.xlane.xlu0 %2666 }
 0x60c   : > { %v3580_v63 = vpop.eup %3579  ;;  %v2768_v40 = vmul.f32 1.442695, %v2720_v27  ;;  %v2722_v11 = vsub.f32 %v4778_v57, %v2667_v21 }
 0x60d   : > { %v4977_v4 = vsel %vm200_vm5, %v3580_v63, 0.0  ;;  %vm5255_vm5 = vcmp.le.s32.totalorder %v3865_v17, %v3939_v35 }
 0x60e   : > { %3585 = vpow2.f32 %v2768_v40  ;;  %v2772_v59 = vmul.f32 1.442695, %v2722_v11  ;;  %2866 = vadd.xlane.f32.xlu0 %v4977_v4 }
 0x610   : > { %v3582_v30 = vpop.eup %3581  ;;  %3587 = vpow2.f32 %v2772_v59 }
 0x611   : > { %v2671_v14 = vpop.xlane.xlu1 %2670  ;;  %v4983_v25 = vsel %vm202_vm8, %v3582_v30, 0.0  ;;  %vm5256_vm8 = vcmp.le.s32.totalorder %v3865_v17, %v3946_v36 }
 0x612   : > { %v2724_v3 = vsub.f32 %v4799_v16, %v2671_v14  ;;  %2870 = vadd.xlane.f32.xlu1 %v4983_v25  ;;  %v3584_v57 = vpop.eup %3583 }
 0x613   : > { %v2675_v20 = vpop.xlane.xlu0 %2674  ;;  %v4991_v61 = vsel %vm204_vm13, %v3584_v57, 0.0  ;;  %vm5257_vm13 = vcmp.le.s32.totalorder %v3865_v17, %v3953_v37 }
 0x614   : > { %v2776_v49 = vmul.f32 1.442695, %v2724_v3  ;;  %v2726_v53 = vsub.f32 %v4812_v26, %v2675_v20  ;;  %2874 = vadd.xlane.f32.xlu0 %v4991_v61 }
 0x616   : > { %3589 = vpow2.f32 %v2776_v49  ;;  %v2780_v28 = vmul.f32 1.442695, %v2726_v53 }
 0x618   : > { %v3586_v24 = vpop.eup %3585  ;;  %3591 = vpow2.f32 %v2780_v28 }
 0x619   : > { %v2679_v5 = vpop.xlane.xlu1 %2678  ;;  %v4997_v16 = vsel %vm5252_vm9, %v3586_v24, 0.0 }
 0x61a   : > { %v3588_v7 = vpop.eup %3587  ;;  %v2728_v26 = vsub.f32 %v4833_v8, %v2679_v5  ;;  %2878 = vadd.xlane.f32.xlu1 %v4997_v16 }
 0x61b   : > { %v2683_v31 = vpop.xlane.xlu0 %2682  ;;  %v5004_v12 = vsel %vm5253_vm11, %v3588_v7, 0.0 }
 0x61c   : > { %v2784_v9 = vmul.f32 1.442695, %v2728_v26  ;;  %v2730_v2 = vsub.f32 %v4846_v23, %v2683_v31  ;;  %2882 = vadd.xlane.f32.xlu0 %v5004_v12 }
 0x61e   : > { %3593 = vpow2.f32 %v2784_v9  ;;  %v2788_v32 = vmul.f32 1.442695, %v2730_v2 }
 0x620   : > { %v3590_v44 = vpop.eup %3589  ;;  %3595 = vpow2.f32 %v2788_v32 }
 0x621   : > { %v2687_v10 = vpop.xlane.xlu1 %2686  ;;  %v5011_v8 = vsel %vm5254_vm15, %v3590_v44, 0.0 }
 0x622   : > { %v3592_v47 = vpop.eup %3591  ;;  %v2732_v33 = vsub.f32 %v4872_v48, %v2687_v10  ;;  %2886 = vadd.xlane.f32.xlu1 %v5011_v8 }
 0x623   : > { %v2691_v56 = vpop.xlane.xlu0 %2690  ;;  %v5018_v23 = vsel %vm5255_vm5, %v3592_v47, 0.0 }
 0x624   : > { %v2792_v15 = vmul.f32 1.442695, %v2732_v33  ;;  %v2734_v19 = vsub.f32 %v4883_v29, %v2691_v56  ;;  %2890 = vadd.xlane.f32.xlu0 %v5018_v23 }
 0x626   : > { %3597 = vpow2.f32 %v2792_v15  ;;  %v2796_v34 = vmul.f32 1.442695, %v2734_v19 }
 0x628   : > { %v3594_v54 = vpop.eup %3593  ;;  %3599 = vpow2.f32 %v2796_v34 }
 0x629   : > { %v2695_v18 = vpop.xlane.xlu1 %2694  ;;  %v5025_v48 = vsel %vm5256_vm8, %v3594_v54, 0.0 }
 0x62a   : > { %v3596_v52 = vpop.eup %3595  ;;  %v2736_v35 = vsub.f32 %v4898_v43, %v2695_v18  ;;  %2894 = vadd.xlane.f32.xlu1 %v5025_v48 }
 0x62b   : > { %v2699_v58 = vpop.xlane.xlu0 %2698  ;;  %v5032_v29 = vsel %vm5257_vm13, %v3596_v52, 0.0 }
 0x62c   : > { %v2800_v27 = vmul.f32 1.442695, %v2736_v35  ;;  %v2738_v21 = vsub.f32 %v4909_v1, %v2699_v58  ;;  %2898 = vadd.xlane.f32.xlu0 %v5032_v29 }
 0x62e   : > { %3601 = vpow2.f32 %v2800_v27  ;;  %v2804_v36 = vmul.f32 1.442695, %v2738_v21 }
 0x630   : > { %v3598_v63 = vpop.eup %3597  ;;  %3603 = vpow2.f32 %v2804_v36 }
 0x631   : > { %v5039_v43 = vsel %vm5258_vm0, %v3598_v63, 0.0 }
 0x632   : > { %v3600_v40 = vpop.eup %3599  ;;  %2902 = vadd.xlane.f32.xlu1 %v5039_v43 }
 0x633   : > { %v2703_v37 = vpop.xlane.xlu1 %2702  ;;  %v5045_v11 = vsel %vm5259_vm14, %v3600_v40, 0.0 }
 0x634   : > { %v2740_v1 = vsub.f32 %v4932_v6, %v2703_v37  ;;  %v2741_v59 = vsub.f32 %v4922_v51, %v2703_v37  ;;  %2906 = vadd.xlane.f32.xlu0 %v5045_v11 }
 0x635   : > { %v2707_v30 = vpop.xlane.xlu0 %2706 }
 0x636   : > { %v2808_v14 = vmul.f32 1.442695, %v2740_v1  ;;  %v2810_v38 = vmul.f32 1.442695, %v2741_v59  ;;  %v2742_v3 = vsub.f32 %v4944_v13, %v2707_v30  ;;  %v2743_v57 = vsub.f32 %v4936_v22, %v2707_v30 }
 0x638   : > { %v3602_v20 = vpop.eup %3601  ;;  %v2814_v49 = vmul.f32 1.442695, %v2743_v57  ;;  %3605 = vpow2.f32 %v2810_v38  ;;  %v2812_v53 = vmul.f32 1.442695, %v2742_v3 }
 0x639   : > { %v5055_v39 = vsel %vm5260_vm6, %v3602_v20, 0.0  ;;  %3607 = vpow2.f32 %v2808_v14 }
 0x63a   : > { %v3604_v6 = vpop.eup %3603  ;;  %2910 = vadd.xlane.f32.xlu1 %v5055_v39  ;;  %3609 = vpow2.f32 %v2814_v49 }
 0x63b   : > { %v5061_v51 = vsel %vm5261_vm3, %v3604_v6, 0.0  ;;  %3611 = vpow2.f32 %v2812_v53 }
 0x63c   : > { %2914 = vadd.xlane.f32.xlu0 %v5061_v51 }
 0x642   : > { %v3606_v22 = vpop.eup %3605 }
 0x643   : > { %v5064_v13 = vpop.eup %3607  ;;  %v5069_v41 = vsel %vm227_vm10, %v3606_v22, 0.0 }
 0x644   : > { %v3610_v28 = vpop.eup %3609  ;;  %v2916_v24 = vsel %vm495_vm1, %v5069_v41, 0.0 }
 0x645   : > { %v2917_v5 = vadd.f32 %v5064_v13, %v2916_v24  ;;  %v5077_v17 = vsel %vm229_vm12, %v3610_v28, 0.0  ;;  %v5079_v50 = vpop.eup %3611 }
 0x646   : > { %v2920_v7 = vsel %vm495_vm1, %v5077_v17, 0.0 }
 0x647   : > { %2918 = vadd.xlane.f32.xlu1 %v2917_v5  ;;  %v2921_v45 = vadd.f32 %v5079_v50, %v2920_v7 }
 0x649   : > { %2922 = vadd.xlane.f32.xlu0 %v2921_v45 }
 0x68f   : > { %v2855_v26 = vpop.xlane.xlu1 %2854 }
 0x690   : > { %3613 = vrcp.f32 %v2855_v26 }
 0x691   : > { %v2859_v31 = vpop.xlane.xlu0 %2858 }
 0x692   : > { %3615 = vrcp.f32 %v2859_v31 }
 0x697   : > { %v2863_v9 = vpop.xlane.xlu1 %2862 }
 0x698   : > { %3617 = vrcp.f32 %v2863_v9 }
 0x69a   : > { %v3614_v2 = vpop.eup %3613 }
 0x69b   : > { %v2867_v32 = vpop.xlane.xlu0 %2866  ;;  %v2943_v55 = vmul.f32 0.0, %v3614_v2  ;;  %v2942_v10 = vmul.f32 %v3614_v2, %v4955_v60 }
 0x69c   : > { %v3616_v46 = vpop.eup %3615  ;;  %3619 = vrcp.f32 %v2867_v32 }
 0x69d   : > { %v2945_v44 = vmul.f32 0.0, %v3616_v46  ;;  %v2944_v47 = vmul.f32 %v3616_v46, %v4962_v42 }
 0x69f   : > { %v2871_v33 = vpop.xlane.xlu1 %2870  ;;  %v2979_v56 = vpack.c.bf16 %v2945_v44, %v2943_v55  ;;  %v2978_v15 = vpack.c.bf16 %v2944_v47, %v2942_v10 }
 0x6a0   : > { %3621 = vrcp.f32 %v2871_v33 }
 0x6a1   : > { %3332 = vmatprep.subr.msk.bf16.mxu0 %vm495_vm1, %v2979_v56  ;;  %v2875_v19 = vpop.xlane.xlu0 %2874 }
 0x6a2   : > { %3032 = vmatpush1.bf16.xpose.msra.mxu0 %v2978_v15  ;;  %3623 = vrcp.f32 %v2875_v19  ;;  %v3618_v34 = vpop.eup %3617 }
 0x6a3   : > { %v2947_v52 = vmul.f32 0.0, %v3618_v34  ;;  %v2946_v58 = vmul.f32 %v3618_v34, %v4969_v0 }
 0x6a6   : > { %v3620_v54 = vpop.eup %3619 }
 0x6a7   : > { %v2879_v18 = vpop.xlane.xlu1 %2878  ;;  %v2949_v35 = vmul.f32 0.0, %v3620_v54  ;;  %v2948_v60 = vmul.f32 %v3620_v54, %v4977_v4 }
 0x6a8   : > { %3625 = vrcp.f32 %v2879_v18 }
 0x6a9   : > { %v2883_v42 = vpop.xlane.xlu0 %2882  ;;  %v2981_v27 = vpack.c.bf16 %v2949_v35, %v2947_v52  ;;  %v2980_v21 = vpack.c.bf16 %v2948_v60, %v2946_v58 }
 0x6aa   : > { %3627 = vrcp.f32 %v2883_v42  ;;  %v3622_v36 = vpop.eup %3621 }
 0x6ab   : > { %3333 = vmatprep.subr.msk.bf16.mxu0 %vm495_vm1, %v2981_v27  ;;  %v2951_v40 = vmul.f32 0.0, %v3622_v36  ;;  %v2950_v0 = vmul.f32 %v3622_v36, %v4983_v25 }
 0x6ac   : > { %3034 = vmatpush1.bf16.xpose.msra.mxu0 %v2980_v21  ;;  %v3624_v63 = vpop.eup %3623 }
 0x6ad   : > { %v2953_v37 = vmul.f32 0.0, %v3624_v63  ;;  %v2952_v1 = vmul.f32 %v3624_v63, %v4991_v61 }
 0x6af   : > { %v2887_v59 = vpop.xlane.xlu1 %2886  ;;  %v2983_v30 = vpack.c.bf16 %v2953_v37, %v2951_v40  ;;  %v2982_v38 = vpack.c.bf16 %v2952_v1, %v2950_v0 }
 0x6b0   : > { %3629 = vrcp.f32 %v2887_v59 }
 0x6b1   : > { %v2891_v4 = vpop.xlane.xlu0 %2890  ;;  %3334 = vmatprep.subr.msk.bf16.mxu0 %vm495_vm1, %v2983_v30 }
 0x6b2   : > { %v3626_v14 = vpop.eup %3625  ;;  %3631 = vrcp.f32 %v2891_v4  ;;  %v5262_v4 = vmov 0.0  }
 0x6b3   : > { %v2955_v57 = vmul.f32 0.0, %v3626_v14  ;;  %v2954_v61 = vmul.f32 %v3626_v14, %v4997_v16 }
 0x6b4   : > { %v3628_v3 = vpop.eup %3627  ;;  %3036 = vmatpush1.bf16.xpose.msra.mxu0 %v2982_v38 }
 0x6b5   : > { %v2957_v20 = vmul.f32 0.0, %v3628_v3  ;;  %v2956_v49 = vmul.f32 %v3628_v3, %v5004_v12 }
 0x6b7   : > { %v2895_v53 = vpop.xlane.xlu1 %2894  ;;  %v2985_v6 = vpack.c.bf16 %v2957_v20, %v2955_v57  ;;  %v2984_v28 = vpack.c.bf16 %v2956_v49, %v2954_v61  ;;  %v3075_v57 = vld [vmem:[#allocation2] sm:$0xff] }
 0x6b8   : > { %3633 = vrcp.f32 %v2895_v53 }
 0x6b9   : > { %3335 = vmatprep.subr.msk.bf16.mxu0 %vm495_vm1, %v2985_v6  ;;  %v2899_v25 = vpop.xlane.xlu0 %2898 }
 0x6ba   : > { %v3630_v22 = vpop.eup %3629  ;;  %3635 = vrcp.f32 %v2899_v25 }
 0x6bb   : > { %v2959_v5 = vmul.f32 0.0, %v3630_v22  ;;  %v2958_v12 = vmul.f32 %v3630_v22, %v5011_v8 }
 0x6bc   : > { %v3632_v24 = vpop.eup %3631  ;;  %3038 = vmatpush1.bf16.xpose.msra.mxu0 %v2984_v28 }
 0x6bd   : > { %v2961_v7 = vmul.f32 0.0, %v3632_v24  ;;  %v2960_v45 = vmul.f32 %v3632_v24, %v5018_v23 }
 0x6bf   : > { %v2903_v26 = vpop.xlane.xlu1 %2902  ;;  %v2987_v31 = vpack.c.bf16 %v2961_v7, %v2959_v5  ;;  %v2986_v2 = vpack.c.bf16 %v2960_v45, %v2958_v12 }
 0x6c0   : > { %3637 = vrcp.f32 %v2903_v26 }
 0x6c1   : > { %3336 = vmatprep.subr.msk.bf16.mxu0 %vm495_vm1, %v2987_v31  ;;  %v2907_v16 = vpop.xlane.xlu0 %2906 }
 0x6c2   : > { %v3634_v9 = vpop.eup %3633  ;;  %3639 = vrcp.f32 %v2907_v16 }
 0x6c3   : > { %v2963_v46 = vmul.f32 0.0, %v3634_v9  ;;  %v2962_v23 = vmul.f32 %v3634_v9, %v5025_v48 }
 0x6c4   : > { %v3636_v32 = vpop.eup %3635  ;;  %3040 = vmatpush1.bf16.xpose.msra.mxu0 %v2986_v2 }
 0x6c5   : > { %v2965_v55 = vmul.f32 0.0, %v3636_v32  ;;  %v2964_v44 = vmul.f32 %v3636_v32, %v5032_v29 }
 0x6c7   : > { %v2911_v10 = vpop.xlane.xlu1 %2910  ;;  %v2989_v47 = vpack.c.bf16 %v2965_v55, %v2963_v46  ;;  %v2988_v56 = vpack.c.bf16 %v2964_v44, %v2962_v23 }
 0x6c8   : > { %3641 = vrcp.f32 %v2911_v10 }
 0x6c9   : > { %3337 = vmatprep.subr.msk.bf16.mxu0 %vm495_vm1, %v2989_v47  ;;  %v2915_v8 = vpop.xlane.xlu0 %2914 }
 0x6ca   : > { %v3638_v33 = vpop.eup %3637  ;;  %3643 = vrcp.f32 %v2915_v8 }
 0x6cb   : > { %v2967_v19 = vmul.f32 0.0, %v3638_v33  ;;  %v2966_v29 = vmul.f32 %v3638_v33, %v5039_v43 }
 0x6cc   : > { %v3640_v15 = vpop.eup %3639  ;;  %3042 = vmatpush1.bf16.xpose.msra.mxu0 %v2988_v56 }
 0x6cd   : > { %v2969_v34 = vmul.f32 0.0, %v3640_v15  ;;  %v2968_v54 = vmul.f32 %v3640_v15, %v5045_v11 }
 0x6cf   : > { %v2991_v18 = vpack.c.bf16 %v2969_v34, %v2967_v19  ;;  %v2990_v35 = vpack.c.bf16 %v2968_v54, %v2966_v29 }
 0x6d1   : > { %3338 = vmatprep.subr.msk.bf16.mxu0 %vm495_vm1, %v2991_v18 }
 0x6d2   : > { %v3642_v52 = vpop.eup %3641 }
 0x6d3   : > { %v2971_v60 = vmul.f32 0.0, %v3642_v52  ;;  %v2970_v11 = vmul.f32 %v3642_v52, %v5055_v39  ;;  %v2998_v39 = vrot.slane %v5226_v62, 4  ;;  %v3074_v62 = vld [vmem:[%s5170_s2] sm:$0xff] }
 0x6d4   : > { %v3644_v48 = vpop.eup %3643  ;;  %3044 = vmatpush1.bf16.xpose.msra.mxu0 %v2990_v35  ;;  %v2919_v58 = vpop.xlane.xlu1 %2918 }
 0x6d5   : > { %v2973_v42 = vmul.f32 0.0, %v3644_v48  ;;  %3645 = vrcp.f32 %v2919_v58  ;;  %v2972_v27 = vmul.f32 %v3644_v48, %v5061_v51 }
 0x6d6   : > { %v2923_v21 = vpop.xlane.xlu0 %2922 }
 0x6d7   : > { %v2993_v36 = vpack.c.bf16 %v2973_v42, %v2971_v60  ;;  %3647 = vrcp.f32 %v2923_v21  ;;  %v2992_v43 = vpack.c.bf16 %v2972_v27, %v2970_v11 }
 0x6d9   : > { %3339 = vmatprep.subr.msk.bf16.mxu0 %vm495_vm1, %v2993_v36 }
 0x6dc   : > { %3046 = vmatpush1.bf16.xpose.msra.mxu0 %v2992_v43 }
 0x6df   : > { %v3646_v63 = vpop.eup %3645 }
 0x6e0   : > { %v2975_v37 = vmul.f32 %v3646_v63, %v5069_v41  ;;  %v2974_v59 = vmul.f32 %v3646_v63, %v5064_v13 }
 0x6e1   : > { %v3648_v40 = vpop.eup %3647 }
 0x6e2   : > { %v2977_v1 = vmul.f32 %v3648_v40, %v5077_v17  ;;  %v2976_v30 = vmul.f32 %v3648_v40, %v5079_v50  ;;  %v3076_v17 = vld [vmem:[#allocation2 + $0x8] sm:$0xff] }
 0x6e4   : > { %v2995_v51 = vpack.c.bf16 %v2977_v1, %v2975_v37  ;;  %v2994_v0 = vpack.c.bf16 %v2976_v30, %v2974_v59 }
 0x6e6   : > { %3340 = vmatprep.subr.msk.bf16.mxu0 %vm495_vm1, %v2995_v51 }
 0x6e7   : > { %3048 = vmatpush1.bf16.xpose.msra.mxu0 %v2994_v0 }
 0x6ee   : > { %3064 = vmatmul.mubr.bf16.vlgmr.msra.gmra.mrb[100].mxu0 %v2998_v39 }
 0x6ef   : > { %3146 = vmatprep.mubr.f32.mxu0 %v5262_v4 }
 0x7c1   : > { %v3065_v14 = vpop.f32.mrb[100].mxu0 }
 0x7c2   : > { %v3067_v38 = vpop.f32.mrb[101].mxu0  ;;  %v3357_v20 = vpack.c.bf16 %v3065_v14, %v3075_v57 }
 0x7c3   : > { %3073 = vst.msk [vmem:[#allocation2 + $0x18] sm:$0xff] %vm495_vm1, %v3067_v38  ;;  %v3069_v41 = vpop.f32.mrb[102].mxu0 }
 0x7c4   : > { %v3070_v13 = vpop.f32.mrb[103].mxu0 }
 0x7ca   : > { %v3078_v50 = vld [vmem:[#allocation2 + $0x18] sm:$0xff] }
 0x7cb   : > { %v3355_v3 = vpack.c.bf16 %v3078_v50, %v3076_v17 }
 0x7cd   : > { %3356 = vmatprep.subr.bf16.mxu0 %v3355_v3 }
 0x7ce   : > { %3358 = vmatpush1.bf16.msra.mxu0 %v3357_v20 }
 0x7d1   : > { %3342 = vmatmul.mubr.msk.f32.vlgmr.msra.gmra.mrb[22].mxu0 %vm495_vm1, %v3074_v62 }
 0x8a4   : > { %v3148_v49 = vpop.f32.mrb[22].mxu0 }
 0x8a5   : > { %3153 = vst [vmem:[%s163_s5] sm:$0xff] %v3148_v49  ;;  %v3150_v53 = vpop.f32.mrb[23].mxu0 }
 0x8a6   : > { %3154 = vst.msk [vmem:[%s163_s5 + $0x8] sm:$0xff] %vm495_vm1, %v3150_v53 }
 0x8a7   : > { %3662 = shalt.err (!%p3659_p3)
}
 0x8a8   : > { %s3663_s24 = scalar_lea.hbm %s5127_s10, 256  ;;  %s3667_s27 = scalar_lea.hbm %s5171_s3, 512 }
 0x8a9   : > { %p3664_p4 = scmp.ne.s32.totalorder %s5127_s10, %s3663_s24  ;;  %p3668_p9 = scmp.lt.u32.totalorder %s5127_s10, %s5171_s3 }
 0x8aa   : > { %p3669_p10 = scmp.lt.u32.totalorder %s3667_s27, %s3663_s24  ;;  %p3671_p12 = scmp.lt.u32.totalorder %s3663_s24, %s5127_s10 }
 0x8ab   : > { %p3665_p7 = pnand %p3664_p4, %p3777_p5 }
 0x8ac   : > { %p3670_p11 = por %p3669_p10, %p3668_p9 }
 0x8ad   : > { %p3666_p8 = pneg %p3665_p7 }
 0x8ae   : > { %p3672_p13 = por %p3671_p12, %p3670_p11 }
 0x8b0   : > { %p3673_p0 = pnand %p3672_p13, %p3666_p8 }
 0x8b2   : > { %3676 = shalt.err (!%p3673_p0)
}
 0x8b3   : > { %3361 = dma.vmem_to_hbm [thread:$0]  (%p3777_p5), %s5122_s6, 256, %s5127_s10, %s3156_s11  }
 0x8b4 PF: > { %p3367_p1 = scmp.ge.s32.totalorder %s3711_s15, 2  ;;  %s3182_s30 = sand.u32 1, %s3699_s12  }
 0x8b5   : > { %s3183_s4 = scalar_lea.sflag [#allocation4], %s3182_s30 }
 0x8b6   : > { %p3364_p2 = pnand %p3367_p1, %p3781_p6 }
 0x8b8   : > { %3694 = dma.done.wait (!%p3364_p2), %s3183_s4, 256  }
 0x8b9   : > { %3696 = vsyncadd (!%p3364_p2), %s3183_s4, 4294967040  ;;  %p13_p3 = scmp.ge.s32.totalorder %s3764_s18, 4   ;;  %s5263_s12 = smov %s3703_s13 }
 0x8ba   : > { %s5264_s13 = smov %s3707_s14  ;;  %s5265_s14 = smov %s3775_s21 }
 0x8bb   : > { %s5266_s15 = smov %s3764_s18  ;;  %15 = sbr.rel (!%p13_p3) target bundleno = 3 (0x3), region = 67 }
 0x8c2   :  { %3188 = vsyncpa [#allocation4], 1 }
 0x8c3   :  { %3190 = vsyncpa [#allocation4 + $0x1], 1 }

</bundles_post_ra>
